<compile_context>
chip_gen: v6e
topology: v6e:2x2x1
jax: 0.10.0
libtpu: 0.0.40
codegen_flags: <defaults>
</compile_context>

<pallas_src>
import math

import jax
import jax.numpy as jnp
from jax.experimental import pallas as pl
from jax.experimental.pallas import tpu as pltpu

# ----------------------------- model dims ---------------------------------
B, S = 2, 8                  # batch, sequence
IN_F, HID, OUT_F = 32, 64, 48
NUM_FREQ = 8
LN_EPS = 1e-5

MAX_ROW_TILE = 2048          # rows per grid step for large B*S (per-step x/out
                             # blocks ~1.3 MiB double-buffered -> well inside
                             # scoped VMEM on v5e/v6e/v7x)
VEC_W = 128                  # packed bias/gain slab width (lane-dense)
VEC_ROWS = 16                # packed bias/gain slab rows (multiple of 8)

# Set to jnp.bfloat16 to use the native bf16 MXU path (v7x emulates f32 dots);
# kept f32 so the self-test matches the torch-f32 reference within 1e-4.
DOT_DTYPE = jnp.float32
# Set True for tanh-approx GELU on the EUP (relaxes exact-erf match vs torch).
GELU_APPROX = False


# ------------------------------ kernel -------------------------------------
def kan_unit_kernel(x_ref, w1a_ref, wo1_ref, w2a_ref, wo2_ref, wr_ref,
                    vec_ref, o_ref):
    x = x_ref[...].astype(jnp.float32)
    V = vec_ref[...].astype(jnp.float32)          # (VEC_ROWS, VEC_W)

    # packed bias / gain rows (see pack_params for layout)
    ln1_g = V[0:1, :IN_F]
    ln1_b = V[1:2, :IN_F]
    b1f   = V[2:3, :HID + 2 * NUM_FREQ]           # [linear1.b | bf*fs | bf*fs + pi/2]
    bo1   = V[3:4, :HID]
    lng1  = V[4:5, :HID]
    lnb1  = V[5:6, :HID]
    ln2_g = V[6:7, :HID]
    ln2_b = V[7:8, :HID]
    b2f   = V[8:9, :OUT_F + 2 * NUM_FREQ]
    bo2   = V[9:10, :OUT_F]
    lng2  = V[10:11, :OUT_F]
    lnb2  = V[11:12, :OUT_F]
    br    = V[12:13, :OUT_F]

    def layer_norm(v, g, b):
        # one-pass variance: mean(v*v) - mu*mu (no mu-dependent second reduce)
        mu = jnp.mean(v, axis=-1, keepdims=True)
        var = jnp.maximum(jnp.mean(v * v, axis=-1, keepdims=True) - mu * mu, 0.0)
        return (v - mu) * jax.lax.rsqrt(var + LN_EPS) * g + b

    def fourier_layer(v, wa_ref, wo_ref, b_fused, bo, lng, lnb, out_dim):
        # fused dot: [linear1 | freq*fs | freq*fs] in one MXU push
        ha = jnp.dot(v.astype(DOT_DTYPE), wa_ref[...].astype(DOT_DTYPE),
                     preferred_element_type=jnp.float32) + b_fused
        lin = ha[:, :out_dim]
        # duplicated freq columns carry a +pi/2 bias, so one sin gives [sin|cos]
        trig = jnp.sin(ha[:, out_dim:out_dim + 2 * NUM_FREQ])
        # fused output projection: [sin|cos] @ [Wo_sin ; Wo_cos]
        fo = jnp.dot(trig.astype(DOT_DTYPE), wo_ref[...].astype(DOT_DTYPE),
                     preferred_element_type=jnp.float32) + bo
        return layer_norm(lin + fo, lng, lnb)

    residual = x
    h = layer_norm(x, ln1_g, ln1_b)
    h = fourier_layer(h, w1a_ref, wo1_ref, b1f, bo1, lng1, lnb1, HID)
    if GELU_APPROX:
        # tanh-approx GELU: moves the work to the otherwise-idle EUP slot
        h = 0.5 * h * (1.0 + jnp.tanh(0.7978845608028654 * (h + 0.044715 * h * h * h)))
    else:
        # exact (erf-based) GELU, matching torch.nn.functional.gelu default
        h = 0.5 * h * (1.0 + jax.lax.erf(h * (1.0 / math.sqrt(2.0))))
    # TODO(synk): dropout(p=0.1) is identity in eval mode; not implemented.
    h = layer_norm(h, ln2_g, ln2_b)
    h = fourier_layer(h, w2a_ref, wo2_ref, b2f, bo2, lng2, lnb2, OUT_F)
    res = jnp.dot(residual.astype(DOT_DTYPE), wr_ref[...].astype(DOT_DTYPE),
                  preferred_element_type=jnp.float32) + br
    o_ref[...] = (h + res).astype(o_ref.dtype)


# ----------------------------- wrapper --------------------------------------
def _num_tensorcores():
    """Best-effort TC-per-chip query (v7x has 2); fall back to 1."""
    try:
        dk = jax.devices()[0].device_kind.lower()
        if "v7" in dk:
            return 2
    except Exception:
        pass
    return 1


def _pick_row_tile(n, n_cores):
    """Rows per grid step: as large as possible, but keep >=2 steps on 2-TC chips."""
    if n_cores >= 2 and n > 8:
        target = pl.cdiv(n, n_cores)      # >=2 "parallel" steps -> both TCs busy
    else:
        target = n                        # single-step collapse on 1-TC chips
    target = min(target, MAX_ROW_TILE)
    t = (target // 8) * 8                 # multiple of 8 for the sublane tiling
    return max(t, 8)


def kan_unit_forward(x, pk):
    """x: (B, S, IN_F), pk: packed params -> (B, S, OUT_F)."""
    b, s, f = x.shape
    assert f == IN_F
    n = b * s
    row_tile = _pick_row_tile(n, _num_tensorcores())
    grid = (pl.cdiv(n, row_tile),)        # ragged last block: OOB rows dropped on store
    x2d = x.reshape(n, f)

    const2d = lambda i: (0, 0)            # constant block index -> DMA'd once
    out2d = pl.pallas_call(
        kan_unit_kernel,
        out_shape=jax.ShapeDtypeStruct((n, OUT_F), x.dtype),
        grid_spec=pltpu.PrefetchScalarGridSpec(
            num_scalar_prefetch=0,
            grid=grid,
            in_specs=[
                pl.BlockSpec((row_tile, IN_F), lambda i: (i, 0)),
                pl.BlockSpec(pk["w1a"].shape, const2d),
                pl.BlockSpec(pk["wo1"].shape, const2d),
                pl.BlockSpec(pk["w2a"].shape, const2d),
                pl.BlockSpec(pk["wo2"].shape, const2d),
                pl.BlockSpec(pk["wr"].shape, const2d),
                pl.BlockSpec(pk["vecs"].shape, const2d),
            ],
            out_specs=pl.BlockSpec((row_tile, OUT_F), lambda i: (i, 0)),
        ),
        compiler_params=pltpu.CompilerParams(
            dimension_semantics=("parallel",)),
    )(x2d, pk["w1a"], pk["wo1"], pk["w2a"], pk["wo2"], pk["wr"], pk["vecs"])
    return out2d.reshape(b, s, OUT_F)


# ------------------- one-time parameter packing ------------------------------
def _pad_row(v):
    return jnp.pad(v, ((0, 0), (0, VEC_W - v.shape[1])))


def pack_params(p):
    """One-time weight transform: fold fs, fuse dots, duplicate freq cols (+pi/2),
    and pack all bias/gain vectors into one (VEC_ROWS, VEC_W) slab."""
    f1_wfs = p["f1_wf"] * p["f1_fs"]
    f2_wfs = p["f2_wf"] * p["f2_fs"]
    f1_bfs = p["f1_bf"] * p["f1_fs"]
    f2_bfs = p["f2_bf"] * p["f2_fs"]
    half_pi = math.pi / 2.0

    # fused first dot: [linear1.W | Wf*fs | Wf*fs]   (in, out + 2*NF)
    w1a = jnp.concatenate([p["f1_w1"], f1_wfs, f1_wfs], axis=1)
    w2a = jnp.concatenate([p["f2_w1"], f2_wfs, f2_wfs], axis=1)
    # fused bias: [b1 | bf*fs | bf*fs + pi/2]  (sin(x+pi/2) == cos(x))
    b1f = jnp.concatenate([p["f1_b1"], f1_bfs, f1_bfs + half_pi], axis=1)
    b2f = jnp.concatenate([p["f2_b1"], f2_bfs, f2_bfs + half_pi], axis=1)
    # fused output projection: [Wo_sin ; Wo_cos]     (2*NF, out)
    wo1 = jnp.concatenate([p["f1_wos"], p["f1_woc"]], axis=0)
    wo2 = jnp.concatenate([p["f2_wos"], p["f2_woc"]], axis=0)

    rows = [p["ln1_g"], p["ln1_b"], b1f, p["f1_bo"], p["f1_lng"], p["f1_lnb"],
            p["ln2_g"], p["ln2_b"], b2f, p["f2_bo"], p["f2_lng"], p["f2_lnb"],
            p["br"]]
    vecs = jnp.concatenate([_pad_row(r) for r in rows], axis=0)
    vecs = jnp.pad(vecs, ((0, VEC_ROWS - vecs.shape[0]), (0, 0)))

    dt = DOT_DTYPE
    return {
        "w1a": w1a.astype(dt), "wo1": wo1.astype(dt),
        "w2a": w2a.astype(dt), "wo2": wo2.astype(dt),
        "wr": p["wr"].astype(dt),
        "vecs": vecs.astype(jnp.float32),
    }


# ---------------------- deterministic parameter init ------------------------
def _xavier_uniform(key, out_f, in_f, gain):
    bound = gain * math.sqrt(6.0 / (in_f + out_f))
    # torch Linear weight is (out, in); return the (in, out) transpose for x @ W
    w = jax.random.uniform(key, (out_f, in_f), jnp.float32, -bound, bound)
    return w.T


def make_fourier_params(key, in_f, out_f, num_freq, prefix):
    k1, k2, k3 = jax.random.split(key, 3)
    wo = _xavier_uniform(k3, out_f, 2 * num_freq, gain=0.5)   # (2F, out)
    return {
        f"{prefix}_w1": _xavier_uniform(k1, out_f, in_f, gain=0.5),
        f"{prefix}_b1": jnp.zeros((1, out_f), jnp.float32),
        f"{prefix}_wf": _xavier_uniform(k2, num_freq, in_f, gain=0.5),
        f"{prefix}_bf": jnp.zeros((1, num_freq), jnp.float32),
        f"{prefix}_fs": jnp.full((1, num_freq), 0.5, jnp.float32),
        f"{prefix}_wos": wo[:num_freq],                        # (F, out)
        f"{prefix}_woc": wo[num_freq:],                        # (F, out)
        f"{prefix}_bo": jnp.zeros((1, out_f), jnp.float32),
        f"{prefix}_lng": jnp.ones((1, out_f), jnp.float32),
        f"{prefix}_lnb": jnp.zeros((1, out_f), jnp.float32),
    }


def make_params(key):
    k1, k2, k3 = jax.random.split(key, 3)
    params = {
        "ln1_g": jnp.ones((1, IN_F), jnp.float32),
        "ln1_b": jnp.zeros((1, IN_F), jnp.float32),
        "ln2_g": jnp.ones((1, HID), jnp.float32),
        "ln2_b": jnp.zeros((1, HID), jnp.float32),
        # residual_proj (in_features != out_features): default torch Linear init
        "wr": _xavier_uniform(k3, OUT_F, IN_F, gain=1.0),
        "br": jnp.zeros((1, OUT_F), jnp.float32),
    }
    params.update(make_fourier_params(k1, IN_F, HID, NUM_FREQ, "f1"))
    params.update(make_fourier_params(k2, HID, OUT_F, NUM_FREQ, "f2"))
    return params


# ------------------------- pure-JAX reference -------------------------------
def reference_forward(x, p):
    def ln(v, g, b):
        mu = jnp.mean(v, -1, keepdims=True)
        var = jnp.mean((v - mu) ** 2, -1, keepdims=True)
        return (v - mu) / jnp.sqrt(var + LN_EPS) * g + b

    def fourier(v, pre):
        lin = v @ p[f"{pre}_w1"] + p[f"{pre}_b1"]
        fp = v @ p[f"{pre}_wf"] + p[f"{pre}_bf"]
        sf = fp * p[f"{pre}_fs"]
        fo = (jnp.sin(sf) @ p[f"{pre}_wos"] + jnp.cos(sf) @ p[f"{pre}_woc"]
              + p[f"{pre}_bo"])
        return ln(lin + fo, p[f"{pre}_lng"], p[f"{pre}_lnb"])

    residual = x
    h = ln(x, p["ln1_g"], p["ln1_b"])
    h = fourier(h, "f1")
    h = 0.5 * h * (1.0 + jax.lax.erf(h / math.sqrt(2.0)))
    h = ln(h, p["ln2_g"], p["ln2_b"])
    h = fourier(h, "f2")
    return h + (residual @ p["wr"] + p["br"])


if __name__ == "__main__":
    key = jax.random.PRNGKey(0)
    kx, kp = jax.random.split(key)
    x = jax.random.normal(kx, (B, S, IN_F), jnp.float32)
    params = make_params(kp)
    packed = pack_params(params)          # one-time weight transform

    out = kan_unit_forward(x, packed)
    out = jax.block_until_ready(out)

    ref = reference_forward(x, params)
    assert out.shape == (B, S, OUT_F)
    assert jnp.allclose(out, ref, atol=1e-4, rtol=1e-4), "mismatch vs reference"
    print("KERNEL_OK")
</pallas_src>

<mosaic_0001>
module attributes {stable_mosaic.version = 11 : i64} {
  func.func @kan_unit_kernel(%arg0: i32, %arg1: memref<16x32xf32, #tpu.memory_space<vmem>>, %arg2: memref<32x80xf32, #tpu.memory_space<vmem>>, %arg3: memref<16x64xf32, #tpu.memory_space<vmem>>, %arg4: memref<64x64xf32, #tpu.memory_space<vmem>>, %arg5: memref<16x48xf32, #tpu.memory_space<vmem>>, %arg6: memref<32x48xf32, #tpu.memory_space<vmem>>, %arg7: memref<16x128xf32, #tpu.memory_space<vmem>>, %arg8: memref<16x48xf32, #tpu.memory_space<vmem>>) attributes {dimension_semantics = [#tpu.dimension_semantics<parallel>], iteration_bounds = array<i64: 1>, scalar_prefetch = 0 : i64, scratch_operands = 0 : i64, tpu.core_type = #tpu.core_type<tc>, window_params = [{transform_indices = @transform_0, window_bounds = array<i64: 16, 32>}, {pipeline_mode = #tpu.pipeline_mode<synchronous>, transform_indices = @transform_1, window_bounds = array<i64: 32, 80>}, {pipeline_mode = #tpu.pipeline_mode<synchronous>, transform_indices = @transform_2, window_bounds = array<i64: 16, 64>}, {pipeline_mode = #tpu.pipeline_mode<synchronous>, transform_indices = @transform_3, window_bounds = array<i64: 64, 64>}, {pipeline_mode = #tpu.pipeline_mode<synchronous>, transform_indices = @transform_4, window_bounds = array<i64: 16, 48>}, {pipeline_mode = #tpu.pipeline_mode<synchronous>, transform_indices = @transform_5, window_bounds = array<i64: 32, 48>}, {pipeline_mode = #tpu.pipeline_mode<synchronous>, transform_indices = @transform_6, window_bounds = array<i64: 16, 128>}, {transform_indices = @transform_7, window_bounds = array<i64: 16, 48>}]} {
    %c0 = arith.constant 0 : index
    %c0_0 = arith.constant 0 : index
    %0 = vector.load %arg1[%c0, %c0_0] : memref<16x32xf32, #tpu.memory_space<vmem>>, vector<16x32xf32>
    %c0_1 = arith.constant 0 : index
    %c0_2 = arith.constant 0 : index
    %1 = vector.load %arg7[%c0_1, %c0_2] : memref<16x128xf32, #tpu.memory_space<vmem>>, vector<16x128xf32>
    %2 = vector.extract_strided_slice %1 {offsets = [0, 0], sizes = [1, 32], strides = [1, 1]} : vector<16x128xf32> to vector<1x32xf32>
    %3 = vector.extract_strided_slice %1 {offsets = [1, 0], sizes = [1, 32], strides = [1, 1]} : vector<16x128xf32> to vector<1x32xf32>
    %4 = vector.extract_strided_slice %1 {offsets = [2, 0], sizes = [1, 80], strides = [1, 1]} : vector<16x128xf32> to vector<1x80xf32>
    %5 = vector.extract_strided_slice %1 {offsets = [3, 0], sizes = [1, 64], strides = [1, 1]} : vector<16x128xf32> to vector<1x64xf32>
    %6 = vector.extract_strided_slice %1 {offsets = [4, 0], sizes = [1, 64], strides = [1, 1]} : vector<16x128xf32> to vector<1x64xf32>
    %7 = vector.extract_strided_slice %1 {offsets = [5, 0], sizes = [1, 64], strides = [1, 1]} : vector<16x128xf32> to vector<1x64xf32>
    %8 = vector.extract_strided_slice %1 {offsets = [6, 0], sizes = [1, 64], strides = [1, 1]} : vector<16x128xf32> to vector<1x64xf32>
    %9 = vector.extract_strided_slice %1 {offsets = [7, 0], sizes = [1, 64], strides = [1, 1]} : vector<16x128xf32> to vector<1x64xf32>
    %10 = vector.extract_strided_slice %1 {offsets = [8, 0], sizes = [1, 64], strides = [1, 1]} : vector<16x128xf32> to vector<1x64xf32>
    %11 = vector.extract_strided_slice %1 {offsets = [9, 0], sizes = [1, 48], strides = [1, 1]} : vector<16x128xf32> to vector<1x48xf32>
    %12 = vector.extract_strided_slice %1 {offsets = [10, 0], sizes = [1, 48], strides = [1, 1]} : vector<16x128xf32> to vector<1x48xf32>
    %13 = vector.extract_strided_slice %1 {offsets = [11, 0], sizes = [1, 48], strides = [1, 1]} : vector<16x128xf32> to vector<1x48xf32>
    %14 = vector.extract_strided_slice %1 {offsets = [12, 0], sizes = [1, 48], strides = [1, 1]} : vector<16x128xf32> to vector<1x48xf32>
    %cst = arith.constant dense<0.000000e+00> : vector<16xf32>
    %15 = vector.multi_reduction <add>, %0, %cst [1] : vector<16x32xf32> to vector<16xf32>
    %16 = vector.shape_cast %15 : vector<16xf32> to vector<16x1xf32>
    %cst_3 = arith.constant 3.200000e+01 : f32
    %17 = vector.broadcast %cst_3 : f32 to vector<16x1xf32>
    %18 = arith.divf %16, %17 : vector<16x1xf32>
    %19 = arith.mulf %0, %0 : vector<16x32xf32>
    %cst_4 = arith.constant dense<0.000000e+00> : vector<16xf32>
    %20 = vector.multi_reduction <add>, %19, %cst_4 [1] : vector<16x32xf32> to vector<16xf32>
    %21 = vector.shape_cast %20 : vector<16xf32> to vector<16x1xf32>
    %cst_5 = arith.constant 3.200000e+01 : f32
    %22 = vector.broadcast %cst_5 : f32 to vector<16x1xf32>
    %23 = arith.divf %21, %22 : vector<16x1xf32>
    %24 = arith.mulf %18, %18 : vector<16x1xf32>
    %25 = arith.subf %23, %24 : vector<16x1xf32>
    %cst_6 = arith.constant 0.000000e+00 : f32
    %26 = vector.broadcast %cst_6 : f32 to vector<16x1xf32>
    %27 = arith.maximumf %25, %26 : vector<16x1xf32>
    %28 = vector.broadcast %18 : vector<16x1xf32> to vector<16x32xf32>
    %29 = arith.subf %0, %28 : vector<16x32xf32>
    %cst_7 = arith.constant 9.99999974E-6 : f32
    %30 = vector.broadcast %cst_7 : f32 to vector<16x1xf32>
    %31 = arith.addf %27, %30 : vector<16x1xf32>
    %32 = math.rsqrt %31 : vector<16x1xf32>
    %33 = vector.broadcast %32 : vector<16x1xf32> to vector<16x32xf32>
    %34 = arith.mulf %29, %33 : vector<16x32xf32>
    %35 = vector.broadcast %2 : vector<1x32xf32> to vector<16x32xf32>
    %36 = arith.mulf %34, %35 : vector<16x32xf32>
    %37 = vector.broadcast %3 : vector<1x32xf32> to vector<16x32xf32>
    %38 = arith.addf %36, %37 : vector<16x32xf32>
    %c0_8 = arith.constant 0 : index
    %c0_9 = arith.constant 0 : index
    %39 = vector.load %arg2[%c0_8, %c0_9] : memref<32x80xf32, #tpu.memory_space<vmem>>, vector<32x80xf32>
    %cst_10 = arith.constant dense<0.000000e+00> : vector<16x80xf32>
    %40 = tpu.matmul %38, %39, %cst_10 {dimension_numbers = #tpu.dot_dimension_numbers<[1], [0], [0], [1], [0, 0, 1, 1], [], []>} : vector<16x32xf32>, vector<32x80xf32>, vector<16x80xf32> -> vector<16x80xf32>
    %41 = vector.broadcast %4 : vector<1x80xf32> to vector<16x80xf32>
    %42 = arith.addf %40, %41 : vector<16x80xf32>
    %43 = vector.extract_strided_slice %42 {offsets = [0, 0], sizes = [16, 64], strides = [1, 1]} : vector<16x80xf32> to vector<16x64xf32>
    %44 = vector.extract_strided_slice %42 {offsets = [0, 64], sizes = [16, 16], strides = [1, 1]} : vector<16x80xf32> to vector<16x16xf32>
    %45 = math.sin %44 : vector<16x16xf32>
    %c0_11 = arith.constant 0 : index
    %c0_12 = arith.constant 0 : index
    %46 = vector.load %arg3[%c0_11, %c0_12] : memref<16x64xf32, #tpu.memory_space<vmem>>, vector<16x64xf32>
    %cst_13 = arith.constant dense<0.000000e+00> : vector<16x64xf32>
    %47 = tpu.matmul %45, %46, %cst_13 {dimension_numbers = #tpu.dot_dimension_numbers<[1], [0], [0], [1], [0, 0, 1, 1], [], []>} : vector<16x16xf32>, vector<16x64xf32>, vector<16x64xf32> -> vector<16x64xf32>
    %48 = vector.broadcast %5 : vector<1x64xf32> to vector<16x64xf32>
    %49 = arith.addf %47, %48 : vector<16x64xf32>
    %50 = arith.addf %43, %49 : vector<16x64xf32>
    %cst_14 = arith.constant dense<0.000000e+00> : vector<16xf32>
    %51 = vector.multi_reduction <add>, %50, %cst_14 [1] : vector<16x64xf32> to vector<16xf32>
    %52 = vector.shape_cast %51 : vector<16xf32> to vector<16x1xf32>
    %cst_15 = arith.constant 6.400000e+01 : f32
    %53 = vector.broadcast %cst_15 : f32 to vector<16x1xf32>
    %54 = arith.divf %52, %53 : vector<16x1xf32>
    %55 = arith.mulf %50, %50 : vector<16x64xf32>
    %cst_16 = arith.constant dense<0.000000e+00> : vector<16xf32>
    %56 = vector.multi_reduction <add>, %55, %cst_16 [1] : vector<16x64xf32> to vector<16xf32>
    %57 = vector.shape_cast %56 : vector<16xf32> to vector<16x1xf32>
    %cst_17 = arith.constant 6.400000e+01 : f32
    %58 = vector.broadcast %cst_17 : f32 to vector<16x1xf32>
    %59 = arith.divf %57, %58 : vector<16x1xf32>
    %60 = arith.mulf %54, %54 : vector<16x1xf32>
    %61 = arith.subf %59, %60 : vector<16x1xf32>
    %cst_18 = arith.constant 0.000000e+00 : f32
    %62 = vector.broadcast %cst_18 : f32 to vector<16x1xf32>
    %63 = arith.maximumf %61, %62 : vector<16x1xf32>
    %64 = vector.broadcast %54 : vector<16x1xf32> to vector<16x64xf32>
    %65 = arith.subf %50, %64 : vector<16x64xf32>
    %cst_19 = arith.constant 9.99999974E-6 : f32
    %66 = vector.broadcast %cst_19 : f32 to vector<16x1xf32>
    %67 = arith.addf %63, %66 : vector<16x1xf32>
    %68 = math.rsqrt %67 : vector<16x1xf32>
    %69 = vector.broadcast %68 : vector<16x1xf32> to vector<16x64xf32>
    %70 = arith.mulf %65, %69 : vector<16x64xf32>
    %71 = vector.broadcast %6 : vector<1x64xf32> to vector<16x64xf32>
    %72 = arith.mulf %70, %71 : vector<16x64xf32>
    %73 = vector.broadcast %7 : vector<1x64xf32> to vector<16x64xf32>
    %74 = arith.addf %72, %73 : vector<16x64xf32>
    %cst_20 = arith.constant 5.000000e-01 : f32
    %75 = vector.broadcast %cst_20 : f32 to vector<16x64xf32>
    %76 = arith.mulf %75, %74 : vector<16x64xf32>
    %cst_21 = arith.constant 0.707106769 : f32
    %77 = vector.broadcast %cst_21 : f32 to vector<16x64xf32>
    %78 = arith.mulf %74, %77 : vector<16x64xf32>
    %79 = math.erf %78 : vector<16x64xf32>
    %cst_22 = arith.constant 1.000000e+00 : f32
    %80 = vector.broadcast %cst_22 : f32 to vector<16x64xf32>
    %81 = arith.addf %80, %79 : vector<16x64xf32>
    %82 = arith.mulf %76, %81 : vector<16x64xf32>
    %cst_23 = arith.constant dense<0.000000e+00> : vector<16xf32>
    %83 = vector.multi_reduction <add>, %82, %cst_23 [1] : vector<16x64xf32> to vector<16xf32>
    %84 = vector.shape_cast %83 : vector<16xf32> to vector<16x1xf32>
    %cst_24 = arith.constant 6.400000e+01 : f32
    %85 = vector.broadcast %cst_24 : f32 to vector<16x1xf32>
    %86 = arith.divf %84, %85 : vector<16x1xf32>
    %87 = arith.mulf %82, %82 : vector<16x64xf32>
    %cst_25 = arith.constant dense<0.000000e+00> : vector<16xf32>
    %88 = vector.multi_reduction <add>, %87, %cst_25 [1] : vector<16x64xf32> to vector<16xf32>
    %89 = vector.shape_cast %88 : vector<16xf32> to vector<16x1xf32>
    %cst_26 = arith.constant 6.400000e+01 : f32
    %90 = vector.broadcast %cst_26 : f32 to vector<16x1xf32>
    %91 = arith.divf %89, %90 : vector<16x1xf32>
    %92 = arith.mulf %86, %86 : vector<16x1xf32>
    %93 = arith.subf %91, %92 : vector<16x1xf32>
    %cst_27 = arith.constant 0.000000e+00 : f32
    %94 = vector.broadcast %cst_27 : f32 to vector<16x1xf32>
    %95 = arith.maximumf %93, %94 : vector<16x1xf32>
    %96 = vector.broadcast %86 : vector<16x1xf32> to vector<16x64xf32>
    %97 = arith.subf %82, %96 : vector<16x64xf32>
    %cst_28 = arith.constant 9.99999974E-6 : f32
    %98 = vector.broadcast %cst_28 : f32 to vector<16x1xf32>
    %99 = arith.addf %95, %98 : vector<16x1xf32>
    %100 = math.rsqrt %99 : vector<16x1xf32>
    %101 = vector.broadcast %100 : vector<16x1xf32> to vector<16x64xf32>
    %102 = arith.mulf %97, %101 : vector<16x64xf32>
    %103 = vector.broadcast %8 : vector<1x64xf32> to vector<16x64xf32>
    %104 = arith.mulf %102, %103 : vector<16x64xf32>
    %105 = vector.broadcast %9 : vector<1x64xf32> to vector<16x64xf32>
    %106 = arith.addf %104, %105 : vector<16x64xf32>
    %c0_29 = arith.constant 0 : index
    %c0_30 = arith.constant 0 : index
    %107 = vector.load %arg4[%c0_29, %c0_30] : memref<64x64xf32, #tpu.memory_space<vmem>>, vector<64x64xf32>
    %cst_31 = arith.constant dense<0.000000e+00> : vector<16x64xf32>
    %108 = tpu.matmul %106, %107, %cst_31 {dimension_numbers = #tpu.dot_dimension_numbers<[1], [0], [0], [1], [0, 0, 1, 1], [], []>} : vector<16x64xf32>, vector<64x64xf32>, vector<16x64xf32> -> vector<16x64xf32>
    %109 = vector.broadcast %10 : vector<1x64xf32> to vector<16x64xf32>
    %110 = arith.addf %108, %109 : vector<16x64xf32>
    %111 = vector.extract_strided_slice %110 {offsets = [0, 0], sizes = [16, 48], strides = [1, 1]} : vector<16x64xf32> to vector<16x48xf32>
    %112 = vector.extract_strided_slice %110 {offsets = [0, 48], sizes = [16, 16], strides = [1, 1]} : vector<16x64xf32> to vector<16x16xf32>
    %113 = math.sin %112 : vector<16x16xf32>
    %c0_32 = arith.constant 0 : index
    %c0_33 = arith.constant 0 : index
    %114 = vector.load %arg5[%c0_32, %c0_33] : memref<16x48xf32, #tpu.memory_space<vmem>>, vector<16x48xf32>
    %cst_34 = arith.constant dense<0.000000e+00> : vector<16x48xf32>
    %115 = tpu.matmul %113, %114, %cst_34 {dimension_numbers = #tpu.dot_dimension_numbers<[1], [0], [0], [1], [0, 0, 1, 1], [], []>} : vector<16x16xf32>, vector<16x48xf32>, vector<16x48xf32> -> vector<16x48xf32>
    %116 = vector.broadcast %11 : vector<1x48xf32> to vector<16x48xf32>
    %117 = arith.addf %115, %116 : vector<16x48xf32>
    %118 = arith.addf %111, %117 : vector<16x48xf32>
    %cst_35 = arith.constant dense<0.000000e+00> : vector<16xf32>
    %119 = vector.multi_reduction <add>, %118, %cst_35 [1] : vector<16x48xf32> to vector<16xf32>
    %120 = vector.shape_cast %119 : vector<16xf32> to vector<16x1xf32>
    %cst_36 = arith.constant 4.800000e+01 : f32
    %121 = vector.broadcast %cst_36 : f32 to vector<16x1xf32>
    %122 = arith.divf %120, %121 : vector<16x1xf32>
    %123 = arith.mulf %118, %118 : vector<16x48xf32>
    %cst_37 = arith.constant dense<0.000000e+00> : vector<16xf32>
    %124 = vector.multi_reduction <add>, %123, %cst_37 [1] : vector<16x48xf32> to vector<16xf32>
    %125 = vector.shape_cast %124 : vector<16xf32> to vector<16x1xf32>
    %cst_38 = arith.constant 4.800000e+01 : f32
    %126 = vector.broadcast %cst_38 : f32 to vector<16x1xf32>
    %127 = arith.divf %125, %126 : vector<16x1xf32>
    %128 = arith.mulf %122, %122 : vector<16x1xf32>
    %129 = arith.subf %127, %128 : vector<16x1xf32>
    %cst_39 = arith.constant 0.000000e+00 : f32
    %130 = vector.broadcast %cst_39 : f32 to vector<16x1xf32>
    %131 = arith.maximumf %129, %130 : vector<16x1xf32>
    %132 = vector.broadcast %122 : vector<16x1xf32> to vector<16x48xf32>
    %133 = arith.subf %118, %132 : vector<16x48xf32>
    %cst_40 = arith.constant 9.99999974E-6 : f32
    %134 = vector.broadcast %cst_40 : f32 to vector<16x1xf32>
    %135 = arith.addf %131, %134 : vector<16x1xf32>
    %136 = math.rsqrt %135 : vector<16x1xf32>
    %137 = vector.broadcast %136 : vector<16x1xf32> to vector<16x48xf32>
    %138 = arith.mulf %133, %137 : vector<16x48xf32>
    %139 = vector.broadcast %12 : vector<1x48xf32> to vector<16x48xf32>
    %140 = arith.mulf %138, %139 : vector<16x48xf32>
    %141 = vector.broadcast %13 : vector<1x48xf32> to vector<16x48xf32>
    %142 = arith.addf %140, %141 : vector<16x48xf32>
    %c0_41 = arith.constant 0 : index
    %c0_42 = arith.constant 0 : index
    %143 = vector.load %arg6[%c0_41, %c0_42] : memref<32x48xf32, #tpu.memory_space<vmem>>, vector<32x48xf32>
    %cst_43 = arith.constant dense<0.000000e+00> : vector<16x48xf32>
    %144 = tpu.matmul %0, %143, %cst_43 {dimension_numbers = #tpu.dot_dimension_numbers<[1], [0], [0], [1], [0, 0, 1, 1], [], []>} : vector<16x32xf32>, vector<32x48xf32>, vector<16x48xf32> -> vector<16x48xf32>
    %145 = vector.broadcast %14 : vector<1x48xf32> to vector<16x48xf32>
    %146 = arith.addf %144, %145 : vector<16x48xf32>
    %147 = arith.addf %142, %146 : vector<16x48xf32>
    %c0_44 = arith.constant 0 : index
    %c0_45 = arith.constant 0 : index
    %148 = vector.load %arg8[%c0_44, %c0_45] : memref<16x48xf32, #tpu.memory_space<vmem>>, vector<16x48xf32>
    tpu.vector_store %arg8[%c0_44, %c0_45], %147 {strides = array<i32>} : memref<16x48xf32, #tpu.memory_space<vmem>>, vector<16x48xf32>,
    return
  }
  func.func @transform_0(%arg0: i32) -> (i32, i32) {
    %c0_i32 = arith.constant 0 : i32
    %c0_i32_0 = arith.constant 0 : i32
    return %arg0, %c0_i32 : i32, i32
  }
  func.func @transform_1(%arg0: i32) -> (i32, i32) {
    %c0_i32 = arith.constant 0 : i32
    %c0_i32_0 = arith.constant 0 : i32
    %c0_i32_1 = arith.constant 0 : i32
    return %c0_i32, %c0_i32_0 : i32, i32
  }
  func.func @transform_2(%arg0: i32) -> (i32, i32) {
    %c0_i32 = arith.constant 0 : i32
    %c0_i32_0 = arith.constant 0 : i32
    %c0_i32_1 = arith.constant 0 : i32
    return %c0_i32, %c0_i32_0 : i32, i32
  }
  func.func @transform_3(%arg0: i32) -> (i32, i32) {
    %c0_i32 = arith.constant 0 : i32
    %c0_i32_0 = arith.constant 0 : i32
    %c0_i32_1 = arith.constant 0 : i32
    return %c0_i32, %c0_i32_0 : i32, i32
  }
  func.func @transform_4(%arg0: i32) -> (i32, i32) {
    %c0_i32 = arith.constant 0 : i32
    %c0_i32_0 = arith.constant 0 : i32
    %c0_i32_1 = arith.constant 0 : i32
    return %c0_i32, %c0_i32_0 : i32, i32
  }
  func.func @transform_5(%arg0: i32) -> (i32, i32) {
    %c0_i32 = arith.constant 0 : i32
    %c0_i32_0 = arith.constant 0 : i32
    %c0_i32_1 = arith.constant 0 : i32
    return %c0_i32, %c0_i32_0 : i32, i32
  }
  func.func @transform_6(%arg0: i32) -> (i32, i32) {
    %c0_i32 = arith.constant 0 : i32
    %c0_i32_0 = arith.constant 0 : i32
    %c0_i32_1 = arith.constant 0 : i32
    return %c0_i32, %c0_i32_0 : i32, i32
  }
  func.func @transform_7(%arg0: i32) -> (i32, i32) {
    %c0_i32 = arith.constant 0 : i32
    %c0_i32_0 = arith.constant 0 : i32
    return %arg0, %c0_i32 : i32, i32
  }
}

</mosaic_0001>

<bundles_post_ra>
// kernel: tpu_custom_call.1
= control target key start
LH: loop header
LB: loop body
LE: loop exit
PB: predicated region body
PF: predicated region fallthrough
CT: control target
= control target key end

     0   :  { %12 = vsyncpa [#allocation3], 0  ;;  %s1926_s0 = inlined_call_operand.hbm [shape: f32[16,32], index: 0, kind: input, shape index: {}]   ;;  %s1927_s1 = inlined_call_operand.hbm [shape: f32[32,80], index: 1, kind: input, shape index: {}]   ;;  %s1928_s2 = inlined_call_operand.hbm [shape: f32[16,64], index: 2, kind: input, shape index: {}]   ;;  %s1929_s3 = inlined_call_operand.hbm [shape: f32[64,64], index: 3, kind: input, shape index: {}]   ;;  %s1930_s4 = inlined_call_operand.hbm [shape: f32[16,48], index: 4, kind: input, shape index: {}]   ;;  %s1931_s5 = inlined_call_operand.hbm [shape: f32[32,48], index: 5, kind: input, shape index: {}]   ;;  %s1932_s6 = inlined_call_operand.hbm [shape: f32[16,128], index: 6, kind: input, shape index: {}]   ;;  %s1933_s7 = inlined_call_operand.hbm [shape: f32[16,48], index: 7, kind: output, shape index: {}]  }
   0x1   :  { %13 = vsyncpa [#allocation6], 0 }
   0x2   :  { %14 = vsyncpa [#allocation9], 0 }
   0x3   :  { %15 = vsyncpa [#allocation12], 0 }
   0x4   :  { %16 = vsyncpa [#allocation4], 0  ;;  %s1569_s24 = smov [#allocation5]   ;;  %s1570_s26 = smov [#allocation8]  }
   0x5   :  { %s34_s25 = sshll.u32 %s1569_s24, 4  ;;  %s58_s27 = sshll.u32 %s1570_s26, 4  ;;  %s35_s25 = int_to_ptr.vmem [resolvable:$true] %s34_s25  ;;  %s59_s27 = int_to_ptr.vmem [resolvable:$true] %s58_s27 }
   0x6   :  { %s1407_s28 = scalar_lea.vmem %s35_s25, 512  ;;  %p1412_p1 = scmp.lt.s32.totalorder %s35_s25, %s35_s25 }
   0x7   :  { %p1408_p0 = scmp.ne.s32.totalorder %s35_s25, %s1407_s28  ;;  %p1413_p2 = scmp.lt.s32.totalorder %s1407_s28, %s1407_s28 }
   0x9   :  { %p1414_p3 = por %p1413_p2, %p1412_p1 }
   0xb   :  { %p1415_p4 = pnand %p1414_p3, %p1408_p0 }
   0xd   :  { %1418 = shalt.err (!%p1415_p4)
}
   0xe   :  { %s1571_s29 = smov 128   ;;  %s1572_s30 = smov 8  }
   0xf   :  { %40 = dma.hbm_to_vmem [thread:$0]  %s1927_s1, 512, %s35_s25, [#allocation6], %s1571_s29, %s1571_s29, %s1572_s30  }
  0x10   :  { %s1427_s10 = scalar_lea.vmem %s59_s27, 1024  ;;  %p1432_p6 = scmp.lt.s32.totalorder %s59_s27, %s59_s27 }
  0x11   :  { %p1428_p5 = scmp.ne.s32.totalorder %s59_s27, %s1427_s10  ;;  %p1433_p7 = scmp.lt.s32.totalorder %s1427_s10, %s1427_s10 }
  0x13   :  { %p1434_p8 = por %p1433_p7, %p1432_p6 }
  0x15   :  { %p1435_p9 = pnand %p1434_p8, %p1428_p5 }
  0x17   :  { %1438 = shalt.err (!%p1435_p9)
}
  0x18   :  { %64 = dma.hbm_to_vmem [thread:$0]  %s1929_s3, 1024, %s59_s27, [#allocation9], %s1571_s29, %s1571_s29, %s1572_s30  }
  0x19   :  { %s1573_s13 = smov [#allocation11]   ;;  %s1574_s15 = smov [#allocation2]  }
  0x1a   :  { %s82_s14 = sshll.u32 %s1573_s13, 4  ;;  %s22_s16 = sshll.u32 %s1574_s15, 4  ;;  %s83_s14 = int_to_ptr.vmem [resolvable:$true] %s82_s14  ;;  %s23_s16 = int_to_ptr.vmem [resolvable:$true] %s22_s16 }
  0x1b   :  { %s1447_s1 = scalar_lea.vmem %s83_s14, 512  ;;  %p1452_p11 = scmp.lt.s32.totalorder %s83_s14, %s83_s14 }
  0x1c   :  { %p1448_p10 = scmp.ne.s32.totalorder %s83_s14, %s1447_s1  ;;  %p1453_p12 = scmp.lt.s32.totalorder %s1447_s1, %s1447_s1 }
  0x1e   :  { %p1454_p13 = por %p1453_p12, %p1452_p11 }
  0x20   :  { %p1455_p0 = pnand %p1454_p13, %p1448_p10 }
  0x22   :  { %1458 = shalt.err (!%p1455_p0)
}
  0x23   :  { %88 = dma.hbm_to_vmem [thread:$0]  %s1931_s5, 512, %s83_s14, [#allocation12], %s1571_s29, %s1571_s29, %s1572_s30  }
  0x24   :  { %s1467_s3 = scalar_lea.vmem %s23_s16, 256  ;;  %p1472_p2 = scmp.lt.s32.totalorder %s23_s16, %s23_s16 }
  0x25   :  { %p1468_p1 = scmp.ne.s32.totalorder %s23_s16, %s1467_s3  ;;  %p1473_p3 = scmp.lt.s32.totalorder %s1467_s3, %s1467_s3 }
  0x27   :  { %p1474_p4 = por %p1473_p3, %p1472_p2 }
  0x29   :  { %p1475_p5 = pnand %p1474_p4, %p1468_p1 }
  0x2b   :  { %1478 = shalt.err (!%p1475_p5)
}
  0x2c   :  { %28 = dma.hbm_to_vmem [thread:$0]  %s1926_s0, 256, %s23_s16, [#allocation3], %s1571_s29, %s1571_s29, %s1572_s30  }
  0x2d   :  { %s1575_s21 = smov [#allocation7]   ;;  %s1576_s23 = smov [#allocation10]  }
  0x2e   :  { %s46_s22 = sshll.u32 %s1575_s21, 4  ;;  %s70_s24 = sshll.u32 %s1576_s23, 4  ;;  %s47_s22 = int_to_ptr.vmem [resolvable:$true] %s46_s22  ;;  %s71_s24 = int_to_ptr.vmem [resolvable:$true] %s70_s24 }
  0x2f   :  { %s1487_s5 = scalar_lea.vmem %s47_s22, 256  ;;  %p1492_p7 = scmp.lt.s32.totalorder %s47_s22, %s47_s22 }
  0x30   :  { %p1488_p6 = scmp.ne.s32.totalorder %s47_s22, %s1487_s5  ;;  %p1493_p8 = scmp.lt.s32.totalorder %s1487_s5, %s1487_s5 }
  0x32   :  { %p1494_p9 = por %p1493_p8, %p1492_p7 }
  0x34   :  { %p1495_p10 = pnand %p1494_p9, %p1488_p6 }
  0x36   :  { %1498 = shalt.err (!%p1495_p10)
}
  0x37   :  { %52 = dma.hbm_to_vmem [thread:$0]  %s1928_s2, 256, %s47_s22, [#allocation6], %s1571_s29, %s1571_s29, %s1572_s30  }
  0x38   :  { %s1507_s0 = scalar_lea.vmem %s71_s24, 256  ;;  %p1512_p12 = scmp.lt.s32.totalorder %s71_s24, %s71_s24 }
  0x39   :  { %p1508_p11 = scmp.ne.s32.totalorder %s71_s24, %s1507_s0  ;;  %p1513_p13 = scmp.lt.s32.totalorder %s1507_s0, %s1507_s0 }
  0x3b   :  { %p1514_p0 = por %p1513_p13, %p1512_p12 }
  0x3d   :  { %p1515_p1 = pnand %p1514_p0, %p1508_p11 }
  0x3f   :  { %1518 = shalt.err (!%p1515_p1)
}
  0x40   :  { %76 = dma.hbm_to_vmem [thread:$0]  %s1930_s4, 256, %s71_s24, [#allocation9], %s1571_s29, %s1571_s29, %s1572_s30  }
  0x41   :  { %s1577_s8 = smov [#allocation13]  }
  0x42   :  { %s94_s9 = sshll.u32 %s1577_s8, 4  ;;  %s95_s9 = int_to_ptr.vmem [resolvable:$true] %s94_s9 }
  0x43   :  { %s1527_s10 = scalar_lea.vmem %s95_s9, 256  ;;  %p1532_p3 = scmp.lt.s32.totalorder %s95_s9, %s95_s9 }
  0x44   :  { %p1528_p2 = scmp.ne.s32.totalorder %s95_s9, %s1527_s10  ;;  %p1533_p4 = scmp.lt.s32.totalorder %s1527_s10, %s1527_s10 }
  0x46   :  { %p1534_p5 = por %p1533_p4, %p1532_p3 }
  0x48   :  { %p1535_p6 = pnand %p1534_p5, %p1528_p2 }
  0x4a   :  { %1538 = shalt.err (!%p1535_p6)
}
  0x4b   :  { %100 = dma.hbm_to_vmem [thread:$0]  %s1932_s6, 256, %s95_s9, [#allocation12], %s1571_s29, %s1571_s29, %s1572_s30  }
  0x4c   :  { %1559 = dma.done.wait [#allocation3], 256  }
  0x4d   :  { %1560 = vsyncadd [#allocation3], 4294967040 }
  0x4e   :  { %1561 = dma.done.wait [#allocation6], 768  }
  0x4f   :  { %1562 = vsyncadd [#allocation6], 4294966528 }
  0x50   :  { %1563 = dma.done.wait [#allocation9], 1280  }
  0x51   :  { %1564 = vsyncadd [#allocation9], 4294966016 }
  0x52   :  { %1565 = dma.done.wait [#allocation12], 768  }
  0x53   :  { %1566 = vsyncadd [#allocation12], 4294966528  ;;  %vm126_vm0 = vcmask 261120   ;;  %v122_v0 = vld [vmem:[#allocation2] sm:$0xff]  ;;  %v123_v1 = vld [vmem:[#allocation2 + $0x8] sm:$0xff]  ;;  %v160_v27 = vlaneseq  ;;  %s1584_s4 = smov 64  }
  0x54   :  { %v127_v2 = vsel %vm126_vm0, %v122_v0, 0.0  ;;  %v136_v3 = vmul.f32 %v122_v0, %v122_v0  ;;  %v137_v4 = vmul.f32 %v123_v1, %v123_v1  ;;  %v130_v6 = vsel %vm126_vm0, %v123_v1, 0.0  ;;  %v175_v8 = vld [vmem:[#allocation5 + $0x18] sm:$0xff]  ;;  %v174_v9 = vld [vmem:[#allocation5 + $0x10] sm:$0xff]  ;;  %v173_v10 = vld [vmem:[#allocation5 + $0x8] sm:$0xff]  ;;  %s1585_s6 = smov 80  }
  0x55   :  { %128 = vadd.xlane.f32.xlu0 %v127_v2  ;;  %1272 = vmatprep.subr.mxu0 %v175_v8  ;;  %v172_v11 = vld [vmem:[#allocation5] sm:$0xff]  ;;  %v1673_v29 = vshrl.u32 %v160_v27, 7  ;;  %v470_v45 = vld [vmem:[#allocation7 + $0x8] sm:$0xff]  ;;  %s1586_s12 = smov [#allocation14]  }
  0x56   :  { %v138_v5 = vsel %vm126_vm0, %v136_v3, 0.0  ;;  %v141_v7 = vsel %vm126_vm0, %v137_v4, 0.0  ;;  %1273 = vmatpush3.msra.mxu0 %v175_v8  ;;  %v1676_v31 = vld [vmem:[#allocation13] sm:$0xff]  ;;  %1283 = vmatprep.subr.mxu1 %v470_v45  ;;  %v1578_v8 = vmov 683565275   ;;  %s1201_s13 = sshll.u32 %s1586_s12, 4  ;;  %s1202_s13 = int_to_ptr.vmem [resolvable:$true] %s1201_s13 }
  0x57   :  { %139 = vadd.xlane.f32.xlu1 %v138_v5  ;;  %1274 = vmatprep.subr.mxu0 %v174_v9  ;;  %v162_v30 = vsub.s32 0, %v1673_v29  ;;  %v168_v32 = vsub.s32 1, %v1673_v29  ;;  %v178_v46 = vsub.s32 2, %v1673_v29  ;;  %s1539_s14 = scalar_lea.vmem %s1202_s13, 256  ;;  %p1544_p8 = scmp.lt.s32.totalorder %s1202_s13, %s1202_s13 }
  0x58   :  { %1275 = vmatpush3.msra.mxu0 %v174_v9  ;;  %1284 = vmatpush3.msra.mxu1 %v470_v45  ;;  %p1540_p7 = scmp.ne.s32.totalorder %s1202_s13, %s1539_s14  ;;  %p1545_p9 = scmp.lt.s32.totalorder %s1539_s14, %s1539_s14 }
  0x59   :  { %131 = vadd.xlane.f32.xlu0 %v130_v6  ;;  %1276 = vmatprep.subr.mxu0 %v173_v10  ;;  %v163_v34 = vrot.slane %v1676_v31, %v162_v30  ;;  %v169_v37 = vrot.slane %v1676_v31, %v168_v32  ;;  %v179_v47 = vrot.slane %v1676_v31, %v178_v46 }
  0x5a   :  { %1277 = vmatpush3.msra.mxu0 %v173_v10  ;;  %v1579_v10 = vmov 2475754826   ;;  %p1546_p10 = por %p1545_p9, %p1544_p8 }
  0x5b   :  { %142 = vadd.xlane.f32.xlu1 %v141_v7  ;;  %1278 = vmatprep.subr.mxu0 %v172_v11 }
  0x5c   :  { %1279 = vmatpush3.msra.mxu0 %v172_v11  ;;  %p1547_p11 = pnand %p1546_p10, %p1540_p7 }
  0xde   :  { %v129_v12 = vpop.xlane.xlu0 %128 }
  0xdf   :  { %v134_v13 = vmul.f32 0.03125, %v129_v12  ;;  %v1580_v12 = vmov 2131351028  }
  0xe0   :  { %v140_v14 = vpop.xlane.xlu1 %139 }
  0xe1   :  { %v146_v15 = vmul.f32 %v134_v13, %v134_v13  ;;  %v144_v16 = vmul.f32 0.03125, %v140_v14  ;;  %v152_v33 = vsub.f32 %v122_v0, %v134_v13 }
  0xe2   :  { %v132_v17 = vpop.xlane.xlu0 %131 }
  0xe3   :  { %v148_v18 = vsub.f32 %v144_v16, %v146_v15  ;;  %v135_v19 = vmul.f32 0.03125, %v132_v17  ;;  %v1581_v17 = vmov 2102212464  }
  0xe4   :  { %v143_v20 = vpop.xlane.xlu1 %142 }
  0xe5   :  { %v150_v21 = vmax.f32 %v148_v18, 0.0  ;;  %v147_v22 = vmul.f32 %v135_v19, %v135_v19  ;;  %v145_v23 = vmul.f32 0.03125, %v143_v20  ;;  %v153_v38 = vsub.f32 %v123_v1, %v135_v19 }
  0xe6   :  { %v1582_v19 = vmov 920167782  }
  0xe7   :  { %v154_v24 = vadd.f32 1e-05, %v150_v21  ;;  %v149_v25 = vsub.f32 %v145_v23, %v147_v22 }
  0xe9   :  { %1361 = vrsqrt.f32 %v154_v24  ;;  %v151_v26 = vmax.f32 %v149_v25, 0.0  ;;  %v1583_v24 = vmov 1326507024  }
  0xeb   :  { %v155_v28 = vadd.f32 1e-05, %v151_v26 }
  0xed   :  { %1363 = vrsqrt.f32 %v155_v28 }
  0xf6   :  { %v1362_v35 = vpop.eup %1361 }
  0xf7   :  { %v158_v36 = vmul.f32 %v1362_v35, %v152_v33 }
  0xf9   :  { %v164_v39 = vmul.f32 %v163_v34, %v158_v36 }
  0xfa   :  { %v1364_v40 = vpop.eup %1363 }
  0xfb   :  { %v159_v41 = vmul.f32 %v1364_v40, %v153_v38  ;;  %v170_v42 = vadd.f32 %v169_v37, %v164_v39 }
  0xfd   :  { %v165_v43 = vmul.f32 %v163_v34, %v159_v41  ;;  %1280 = vmatprep.mubr.msk.f32.mxu0 %vm126_vm0, %v170_v42 }
  0xff   :  { %v171_v44 = vadd.f32 %v169_v37, %v165_v43 }
 0x101   :  { %1281 = vmatmul.mubr.msk.f32.vlgmr.msra.gmra.mxu0 %vm126_vm0, %v171_v44 }
 0x1c1   :  { %v1282_v48 = vpop.f32.mrf.mxu0 }
 0x1c2   :  { %v1691_v49 = vadd.f32 %v1282_v48, %v179_v47 }
 0x1c3   :  { %v252_v50 = vpop.f32.mrf.mxu0 }
 0x1c4   :  { %v368_v51 = vand.u32 2139095040, %v1691_v49  ;;  %v1694_v52 = vadd.f32 %v252_v50, %v179_v47  ;;  %v365_v53 = vand.u32 2147483647, %v1691_v49  ;;  %vm367_vm15 = vcmp.lt.s32.totalorder %v1691_v49, 0 }
 0x1c6   :  { %v369_v54 = vshrl.u32 %v368_v51, 23  ;;  %v264_v55 = vand.u32 2139095040, %v1694_v52  ;;  %v372_v58 = vand.u32 8388607, %v365_v53  ;;  %v261_v59 = vand.u32 2147483647, %v1694_v52 }
 0x1c8   :  { %v1222_v56 = vadd.s32 4294967169, %v369_v54  ;;  %v265_v57 = vshrl.u32 %v264_v55, 23  ;;  %v373_v63 = vor.u32 8388608, %v372_v58  ;;  %v268_v1 = vand.u32 8388607, %v261_v59 }
 0x1ca   :  { %v375_v60 = vadd.s32 1, %v1222_v56  ;;  %v1218_v61 = vadd.s32 4294967169, %v265_v57  ;;  %v1703_v7 = vshll.u32 %v373_v63, 8  ;;  %v269_v14 = vor.u32 8388608, %v268_v1 }
 0x1cc   :  { %vm376_vm1 = vcmp.gt.s32.totalorder %v375_v60, 0  ;;  %v271_v62 = vadd.s32 1, %v1218_v61  ;;  %v309_v51 = vshll.u32 %v269_v14, 8 }
 0x1cd   :  { %v377_v0 = vsel %vm376_vm1, %v375_v60, 0  ;;  %vm366_vm1 = vcmp.le.f32.partialorder %v365_v53, 0.7853982 }
 0x1ce   :  { %v379_v2 = vand.u32 31, %v377_v0  ;;  %vm272_vm2 = vcmp.gt.s32.totalorder %v271_v62, 0  ;;  %v378_v4 = vshrl.u32 %v377_v0, 5 }
 0x1cf   :  { %v273_v3 = vsel %vm272_vm2, %v271_v62, 0  ;;  %vm263_vm2 = vcmp.lt.s32.totalorder %v1694_v52, 0 }
 0x1d0   :  { %v380_v5 = vsub.s32 32, %v379_v2  ;;  %v275_v6 = vand.u32 31, %v273_v3  ;;  %v382_v9 = vshll.u32 %v1578_v8, %v379_v2  ;;  %v385_v11 = vshll.u32 %v1579_v10, %v379_v2 }
 0x1d1   :  { %v388_v13 = vshll.u32 %v1580_v12, %v379_v2  ;;  %v391_v18 = vshll.u32 %v1581_v17, %v379_v2  ;;  %v394_v20 = vshll.u32 %v1582_v19, %v379_v2  ;;  %vm397_vm3 = vcmp.lt.s32.totalorder %v378_v4, 1 }
 0x1d2   :  { %v383_v15 = vshrl.u32 %v1579_v10, %v380_v5  ;;  %v386_v16 = vshrl.u32 %v1580_v12, %v380_v5  ;;  %v276_v21 = vsub.s32 32, %v275_v6  ;;  %v389_v22 = vshrl.u32 %v1581_v17, %v380_v5 }
 0x1d3   :  { %v392_v23 = vshrl.u32 %v1582_v19, %v380_v5  ;;  %v395_v25 = vshrl.u32 %v1583_v24, %v380_v5  ;;  %v381_v26 = vshrl.u32 %v1578_v8, %v380_v5  ;;  %vm398_vm4 = vcmp.lt.s32.totalorder %v378_v4, 2 }
 0x1d4   :  { %v384_v27 = vor.u32 %v383_v15, %v382_v9  ;;  %v387_v28 = vor.u32 %v386_v16, %v385_v11  ;;  %v390_v33 = vor.u32 %v389_v22, %v388_v13  ;;  %vm399_vm5 = vcmp.lt.s32.totalorder %v378_v4, 3 }
 0x1d5   :  { %v393_v34 = vor.u32 %v392_v23, %v391_v18  ;;  %v396_v35 = vor.u32 %v395_v25, %v394_v20  ;;  %vm400_vm6 = vcmp.lt.s32.totalorder %v378_v4, 4  ;;  %v279_v45 = vshrl.u32 %v1579_v10, %v276_v21 }
 0x1d6   :  { %v401_v36 = vsel %vm397_vm3, %v381_v26, %v384_v27  ;;  %v405_v37 = vsel %vm397_vm3, %v384_v27, %v387_v28  ;;  %v402_v38 = vsel %vm400_vm6, %v390_v33, 2102212464  ;;  %v409_v40 = vsel %vm397_vm3, %v387_v28, %v390_v33 }
 0x1d7   :  { %v406_v39 = vsel %vm400_vm6, %v393_v34, 920167782  ;;  %v410_v41 = vsel %vm400_vm6, %v396_v35, 1326507024  ;;  %v403_v42 = vsel %vm399_vm5, %v387_v28, %v402_v38  ;;  %v278_v50 = vshll.u32 %v1578_v8, %v275_v6 }
 0x1d8   :  { %v407_v43 = vsel %vm399_vm5, %v390_v33, %v406_v39  ;;  %v411_v44 = vsel %vm399_vm5, %v393_v34, %v410_v41  ;;  %v274_v58 = vshrl.u32 %v273_v3, 5  ;;  %v404_v60 = vsel %vm398_vm4, %v401_v36, %v403_v42 }
 0x1d9   :  { %v408_v47 = vsel %vm398_vm4, %v405_v37, %v407_v43  ;;  %v412_v48 = vsel %vm398_vm4, %v409_v40, %v411_v44  ;;  %v281_v61 = vshll.u32 %v1579_v10, %v275_v6  ;;  %v282_v62 = vshrl.u32 %v1580_v12, %v276_v21 }
 0x1da   :  { %v1721_v54 = vmul.u32.u64.low %v1703_v7, %v412_v48  ;;  %v1722_v55 = vmul.u32.u64.high %v1703_v7, %v412_v48, %v1721_v54  ;;  %v1725_v56 = vmul.u32.u64.low %v1703_v7, %v408_v47  ;;  %v1726_v57 = vmul.u32.u64.high %v1703_v7, %v408_v47, %v1725_v56 }
 0x1db   :  { %v280_v63 = vor.u32 %v279_v45, %v278_v50  ;;  %v284_v0 = vshll.u32 %v1580_v12, %v275_v6  ;;  %v285_v1 = vshrl.u32 %v1581_v17, %v276_v21  ;;  %v288_v2 = vshrl.u32 %v1582_v19, %v276_v21 }
 0x1dc   :  { %v283_v5 = vor.u32 %v282_v62, %v281_v61  ;;  %v287_v9 = vshll.u32 %v1581_v17, %v275_v6  ;;  %v290_v11 = vshll.u32 %v1582_v19, %v275_v6  ;;  %v291_v3 = vshrl.u32 %v1583_v24, %v276_v21 }
 0x1dd   :  { %v420_v4 = vmul.u32 %v1703_v7, %v404_v60  ;;  %vm422_vm7 = vc.u32 %v1722_v55, %v1725_v56  ;;  %v423_v13 = vadd.s32 1, %v1726_v57  ;;  %v286_v14 = vor.u32 %v285_v1, %v284_v0 }
 0x1de   :  { %v289_v15 = vor.u32 %v288_v2, %v287_v9  ;;  %v292_v16 = vor.u32 %v291_v3, %v290_v11  ;;  %vm293_vm8 = vcmp.lt.s32.totalorder %v274_v58, 1  ;;  %vm296_vm9 = vcmp.lt.s32.totalorder %v274_v58, 4 }
 0x1df   :  { %v424_v18 = vsel %vm422_vm7, %v423_v13, %v1726_v57  ;;  %v277_v20 = vshrl.u32 %v1578_v8, %v276_v21  ;;  %v298_v22 = vsel %vm296_vm9, %v286_v14, 2102212464  ;;  %v301_v6 = vsel %vm293_vm8, %v280_v63, %v283_v5 }
 0x1e0   :  { %v425_v23 = vadd.s32 %v424_v18, %v420_v4  ;;  %vm295_vm10 = vcmp.lt.s32.totalorder %v274_v58, 3  ;;  %v302_v25 = vsel %vm296_vm9, %v289_v15, 920167782  ;;  %v305_v7 = vsel %vm293_vm8, %v283_v5, %v286_v14 }
 0x1e1   :  { %vm294_vm11 = vcmp.lt.s32.totalorder %v274_v58, 2  ;;  %v297_v26 = vsel %vm293_vm8, %v277_v20, %v280_v63  ;;  %v303_v27 = vsel %vm295_vm10, %v286_v14, %v302_v25  ;;  %v306_v28 = vsel %vm296_vm9, %v292_v16, 1326507024 }
 0x1e2   :  { %v426_v33 = vadd.s32 536870912, %v425_v23  ;;  %v299_v34 = vsel %vm295_vm10, %v283_v5, %v298_v22  ;;  %v304_v35 = vsel %vm294_vm11, %v301_v6, %v303_v27  ;;  %v307_v36 = vsel %vm295_vm10, %v289_v15, %v306_v28 }
 0x1e3   :  { %v308_v37 = vsel %vm294_vm11, %v305_v7, %v307_v36  ;;  %v1744_v38 = vmul.u32.u64.low %v309_v51, %v304_v35  ;;  %v1745_v39 = vmul.u32.u64.high %v309_v51, %v304_v35, %v1744_v38  ;;  %v300_v42 = vsel %vm294_vm11, %v297_v26, %v299_v34 }
 0x1e4   :  { %v427_v40 = vshrl.u32 %v426_v33, 30  ;;  %v1747_v21 = vmul.u32.u64.low %v309_v51, %v308_v37  ;;  %v1748_v41 = vmul.u32.u64.high %v309_v51, %v308_v37, %v1747_v21  ;;  %v316_v47 = vmul.u32 %v309_v51, %v300_v42 }
 0x1e5   :  { %v319_v44 = vadd.s32 1, %v1745_v39  ;;  %v421_v2 = vadd.s32 %v1725_v56, %v1722_v55  ;;  %vm1763_vm3 = vcmp.le.f32.partialorder %v261_v59, 0.7853982  ;;  %vm457_vm7 = vweird.f32 %v1691_v49 }
 0x1e6   :  { %v428_v43 = vshll.u32 %v427_v40, 30  ;;  %vm318_vm12 = vc.u32 %v1748_v41, %v1744_v38  ;;  %v317_v7 = vadd.s32 %v1744_v38, %v1748_v41  ;;  %v451_v27 = vsub.s32 4, %v427_v40 }
 0x1e7   :  { %v320_v48 = vsel %vm318_vm12, %v319_v44, %v1745_v39  ;;  %vm353_vm11 = vweird.f32 %v1694_v52  ;;  %vm481_vm12 = vcmask 130048  }
 0x1e8   :  { %v429_v45 = vsub.s32 %v425_v23, %v428_v43  ;;  %v321_v54 = vadd.s32 %v320_v48, %v316_v47  ;;  %v452_v21 = vsel %vm367_vm15, %v451_v27, %v427_v40 }
 0x1e9   :  { %v454_v43 = vsel %vm366_vm1, 0, %v452_v21 }
 0x1ea   :  { %v431_v50 = vsub.s32 0, %v429_v45  ;;  %v322_v58 = vadd.s32 536870912, %v321_v54  ;;  %v458_v47 = vadd.s32 3, %v454_v43 }
 0x1ec   :  { %v1223_v57 = vmin.u32 %v431_v50, %v429_v45  ;;  %v323_v61 = vshrl.u32 %v322_v58, 30 }
 0x1ee   :  { %v433_v60 = vclz %v1223_v57  ;;  %v324_v63 = vshll.u32 %v323_v61, 30  ;;  %v347_v53 = vsub.s32 4, %v323_v61  ;;  %v459_v57 = vand.u32 3, %v458_v47 }
 0x1f0   :  { %v1224_v62 = vadd.s32 4294967294, %v433_v60  ;;  %v325_v1 = vsub.s32 %v321_v54, %v324_v63  ;;  %v348_v58 = vsel %vm263_vm2, %v347_v53, %v323_v61  ;;  %vm464_vm4 = vcmp.eq.s32.totalorder %v459_v57, 2 }
 0x1f1   :  { %v350_v59 = vsel %vm1763_vm3, 0, %v348_v58  ;;  %vm461_vm5 = vcmp.eq.s32.totalorder %v459_v57, 0  ;;  %vm460_vm6 = vcmp.lt.s32.totalorder %v459_v57, 2  ;;  %v599_v57 = vsub.s32 4, %v1673_v29 }
 0x1f2   :  { %vm1225_vm13 = vcmp.lt.s32.totalorder %v1224_v62, 0  ;;  %v327_v9 = vsub.s32 0, %v325_v1  ;;  %v605_v58 = vsub.s32 5, %v1673_v29 }
 0x1f3   :  { %v436_v0 = vsel %vm1225_vm13, 0, %v1224_v62  ;;  %vm563_vm13 = vcmask 523264  }
 0x1f4   :  { %v437_v5 = vsub.s32 32, %v436_v0  ;;  %v441_v51 = vsub.s32 4294967266, %v436_v0  ;;  %v438_v11 = vshll.u32 %v429_v45, %v436_v0  ;;  %v1219_v13 = vmin.u32 %v327_v9, %v325_v1  ;;  %v469_v45 = vld [vmem:[#allocation7] sm:$0xff] }
 0x1f5   :  { %1285 = vmatprep.subr.mxu1 %v469_v45 }
 0x1f6   :  { %v439_v3 = vshrl.u32 %v421_v2, %v437_v5  ;;  %v442_v4 = vadd.s32 127, %v441_v51  ;;  %v329_v16 = vclz %v1219_v13  ;;  %1286 = vmatpush3.msra.mxu1 %v469_v45  ;;  %v354_v51 = vadd.s32 3, %v350_v59 }
 0x1f8   :  { %v440_v14 = vor.u32 %v439_v3, %v438_v11  ;;  %v443_v15 = vshll.u32 %v442_v4, 23  ;;  %v1220_v20 = vadd.s32 4294967294, %v329_v16  ;;  %v355_v61 = vand.u32 3, %v354_v51 }
 0x1fa   :  { %v444_v18 = vor.u32 4788187, %v443_v15  ;;  %v447_v6 = vcvt.s32.f32 %v440_v14  ;;  %vm1221_vm14 = vcmp.lt.s32.totalorder %v1220_v20, 0  ;;  %vm360_vm8 = vcmp.eq.s32.totalorder %v355_v61, 2 }
 0x1fb   :  { %v332_v25 = vsel %vm1221_vm14, 0, %v1220_v20  ;;  %vm357_vm9 = vcmp.eq.s32.totalorder %v355_v61, 0  ;;  %vm356_vm10 = vcmp.lt.s32.totalorder %v355_v61, 2 }
 0x1fc   :  { %v445_v22 = vand.u32 2147483647, %v444_v18  ;;  %v333_v55 = vsub.s32 32, %v332_v25  ;;  %v337_v56 = vsub.s32 4294967266, %v332_v25  ;;  %v334_v28 = vshll.u32 %v325_v1, %v332_v25 }
 0x1fe   :  { %v448_v23 = vmul.f32 %v447_v6, %v445_v22  ;;  %v335_v33 = vshrl.u32 %v317_v7, %v333_v55  ;;  %v338_v34 = vadd.s32 127, %v337_v56  ;;  %v473_v6 = vsub.s32 3, %v1673_v29 }
 0x200   :  { %v449_v26 = vxor.u32 2147483648, %v448_v23  ;;  %v336_v37 = vor.u32 %v335_v33, %v334_v28  ;;  %v339_v39 = vshll.u32 %v338_v34, 23 }
 0x202   :  { %v450_v35 = vsel %vm367_vm15, %v449_v26, %v448_v23  ;;  %v340_v38 = vor.u32 4788187, %v339_v39  ;;  %v343_v42 = vcvt.s32.f32 %v336_v37  ;;  %v474_v23 = vrot.slane %v1676_v31, %v473_v6 }
 0x203   :  { %v453_v36 = vsel %vm366_vm1, %v1691_v49, %v450_v35 }
 0x204   :  { %1365 = vcosq.f32 %v453_v36  ;;  %v341_v41 = vand.u32 2147483647, %v340_v38 }
 0x205   :  { %1367 = vsinq.f32 %v453_v36 }
 0x206   :  { %v344_v44 = vmul.f32 %v343_v42, %v341_v41 }
 0x208   :  { %v345_v48 = vxor.u32 2147483648, %v344_v44 }
 0x20a   :  { %v346_v40 = vsel %vm263_vm2, %v345_v48, %v344_v44 }
 0x20b   :  { %v349_v54 = vsel %vm1763_vm3, %v1694_v52, %v346_v40 }
 0x20c   :  { %1369 = vcosq.f32 %v349_v54 }
 0x20d   :  { %1371 = vsinq.f32 %v349_v54 }
 0x211   :  { %v1366_v60 = vpop.eup %1365 }
 0x212   :  { %v1368_v62 = vpop.eup %1367  ;;  %v465_v63 = vxor.u32 2147483648, %v1366_v60 }
 0x213   :  { %v462_v0 = vxor.u32 2147483648, %v1368_v62 }
 0x214   :  { %v466_v1 = vsel %vm464_vm4, %v465_v63, %v1368_v62  ;;  %v600_v62 = vrot.slane %v1676_v31, %v599_v57 }
 0x215   :  { %v463_v2 = vsel %vm461_vm5, %v1366_v60, %v462_v0 }
 0x216   :  { %v467_v5 = vsel %vm460_vm6, %v463_v2, %v466_v1  ;;  %v606_v1 = vrot.slane %v1676_v31, %v605_v58 }
 0x217   :  { %v468_v9 = vsel %vm457_vm7, nan, %v467_v5 }
 0x218   :  { %479 = vrot.lane.b32.xlu1 %v468_v9, %s1584_s4 }
 0x219   :  { %v1370_v11 = vpop.eup %1369 }
 0x21a   :  { %v1372_v3 = vpop.eup %1371  ;;  %v361_v4 = vxor.u32 2147483648, %v1370_v11 }
 0x21b   :  { %v358_v13 = vxor.u32 2147483648, %v1372_v3 }
 0x21c   :  { %v362_v14 = vsel %vm360_vm8, %v361_v4, %v1372_v3 }
 0x21d   :  { %v359_v15 = vsel %vm357_vm9, %v1370_v11, %v358_v13 }
 0x21e   :  { %v363_v16 = vsel %vm356_vm10, %v359_v15, %v362_v14 }
 0x21f   :  { %v364_v18 = vsel %vm353_vm11, nan, %v363_v16 }
 0x220   :  { %477 = vrot.lane.b32.xlu0 %v364_v18, %s1584_s4 }
 0x28a   :  { %v480_v22 = vpop.permute.xlu1 %479 }
 0x292   :  { %v478_v20 = vpop.permute.xlu0 %477 }
 0x293   :  { %1287 = vmatprep.mubr.msk.f32.mxu1 %vm481_vm12, %v478_v20 }
 0x294   :  { %1288 = vmatmul.mubr.msk.f32.vlgmr.msra.gmra.mxu1 %vm481_vm12, %v480_v22 }
 0x354   :  { %v1289_v25 = vpop.f32.mrf.mxu1 }
 0x355   :  { %v558_v7 = vadd.f32 %v1289_v25, %v474_v23 }
 0x356   :  { %v552_v55 = vpop.f32.mrf.mxu1 }
 0x357   :  { %v562_v56 = vadd.f32 %v558_v7, %v1691_v49  ;;  %v553_v26 = vadd.f32 %v552_v55, %v474_v23 }
 0x359   :  { %v561_v27 = vadd.f32 %v553_v26, %v1694_v52  ;;  %v567_v28 = vsel %vm563_vm13, %v562_v56, 0.0  ;;  %v574_v35 = vmul.f32 %v562_v56, %v562_v56 }
 0x35a   :  { %568 = vadd.xlane.f32.xlu0 %v567_v28  ;;  %v670_v28 = vld [vmem:[#allocation8 + $0x38] sm:$0xff] }
 0x35b   :  { %v564_v33 = vsel %vm563_vm13, %v561_v27, 0.0  ;;  %v573_v34 = vmul.f32 %v561_v27, %v561_v27  ;;  %v578_v37 = vsel %vm563_vm13, %v574_v35, 0.0  ;;  %1290 = vmatprep.subr.mxu1 %v670_v28  ;;  %v667_v35 = vld [vmem:[#allocation8 + $0x20] sm:$0xff] }
 0x35c   :  { %565 = vadd.xlane.f32.xlu1 %v564_v33  ;;  %v669_v33 = vld [vmem:[#allocation8 + $0x30] sm:$0xff]  ;;  %1291 = vmatpush3.msra.mxu1 %v670_v28 }
 0x35d   :  { %v575_v36 = vsel %vm563_vm13, %v573_v34, 0.0  ;;  %v668_v34 = vld [vmem:[#allocation8 + $0x28] sm:$0xff]  ;;  %1292 = vmatprep.subr.mxu1 %v669_v33 }
 0x35e   :  { %576 = vadd.xlane.f32.xlu0 %v575_v36  ;;  %1293 = vmatpush3.msra.mxu1 %v669_v33  ;;  %v666_v36 = vld [vmem:[#allocation8 + $0x18] sm:$0xff] }
 0x35f   :  { %1294 = vmatprep.subr.mxu1 %v668_v34 }
 0x360   :  { %579 = vadd.xlane.f32.xlu1 %v578_v37  ;;  %1295 = vmatpush3.msra.mxu1 %v668_v34  ;;  %v665_v37 = vld [vmem:[#allocation8 + $0x10] sm:$0xff] }
 0x361   :  { %1296 = vmatprep.subr.mxu1 %v667_v35 }
 0x362   :  { %1297 = vmatpush3.msra.mxu1 %v667_v35 }
 0x363   :  { %1298 = vmatprep.subr.mxu1 %v666_v36 }
 0x364   :  { %1299 = vmatpush3.msra.mxu1 %v666_v36 }
 0x365   :  { %1300 = vmatprep.subr.mxu1 %v665_v37 }
 0x366   :  { %1301 = vmatpush3.msra.mxu1 %v665_v37 }
 0x3e3   :  { %v569_v39 = vpop.xlane.xlu0 %568 }
 0x3e4   :  { %v572_v49 = vmul.f32 0.015625, %v569_v39  ;;  %v664_v39 = vld [vmem:[#allocation8 + $0x8] sm:$0xff] }
 0x3e5   :  { %v566_v21 = vpop.xlane.xlu1 %565  ;;  %1302 = vmatprep.subr.mxu1 %v664_v39 }
 0x3e6   :  { %v571_v38 = vmul.f32 0.015625, %v566_v21  ;;  %v584_v44 = vmul.f32 %v572_v49, %v572_v49  ;;  %v590_v0 = vsub.f32 %v562_v56, %v572_v49  ;;  %v663_v21 = vld [vmem:[#allocation8] sm:$0xff]  ;;  %1303 = vmatpush3.msra.mxu1 %v664_v39 }
 0x3e7   :  { %v577_v41 = vpop.xlane.xlu0 %576  ;;  %1304 = vmatprep.subr.mxu1 %v663_v21 }
 0x3e8   :  { %v583_v52 = vmul.f32 %v571_v38, %v571_v38  ;;  %v581_v42 = vmul.f32 0.015625, %v577_v41  ;;  %v589_v60 = vsub.f32 %v561_v27, %v571_v38  ;;  %1305 = vmatpush3.msra.mxu1 %v663_v21 }
 0x3e9   :  { %v580_v43 = vpop.xlane.xlu1 %579 }
 0x3ea   :  { %v585_v45 = vsub.f32 %v581_v42, %v583_v52  ;;  %v582_v47 = vmul.f32 0.015625, %v580_v43 }
 0x3ec   :  { %v587_v48 = vmax.f32 %v585_v45, 0.0  ;;  %v586_v53 = vsub.f32 %v582_v47, %v584_v44 }
 0x3ee   :  { %v591_v50 = vadd.f32 1e-05, %v587_v48  ;;  %v588_v40 = vmax.f32 %v586_v53, 0.0 }
 0x3f0   :  { %1373 = vrsqrt.f32 %v591_v50  ;;  %v592_v54 = vadd.f32 1e-05, %v588_v40 }
 0x3f2   :  { %1375 = vrsqrt.f32 %v592_v54 }
 0x3fd   :  { %v1374_v63 = vpop.eup %1373 }
 0x3fe   :  { %v595_v59 = vmul.f32 %v1374_v63, %v589_v60  ;;  %v659_v63 = vsub.s32 7, %v1673_v29 }
 0x3ff   :  { %v1376_v2 = vpop.eup %1375 }
 0x400   :  { %v601_v5 = vmul.f32 %v600_v62, %v595_v59  ;;  %v596_v51 = vmul.f32 %v1376_v2, %v590_v0 }
 0x402   :  { %v607_v9 = vadd.f32 %v606_v1, %v601_v5  ;;  %v602_v61 = vmul.f32 %v600_v62, %v596_v51  ;;  %v653_v62 = vsub.s32 6, %v1673_v29  ;;  %v660_v51 = vrot.slane %v1676_v31, %v659_v63 }
 0x404   :  { %v611_v11 = vmul.f32 0.70710677, %v607_v9  ;;  %v608_v3 = vadd.f32 %v606_v1, %v602_v61  ;;  %v609_v14 = vmul.f32 0.5, %v607_v9  ;;  %v654_v59 = vrot.slane %v1676_v31, %v653_v62 }
 0x406   :  { %1377 = verf.f32 %v611_v11  ;;  %v612_v4 = vmul.f32 0.70710677, %v608_v3  ;;  %v610_v20 = vmul.f32 0.5, %v608_v3 }
 0x408   :  { %1379 = verf.f32 %v612_v4 }
 0x413   :  { %v1378_v13 = vpop.eup %1377 }
 0x414   :  { %v615_v15 = vadd.f32 1.0, %v1378_v13 }
 0x415   :  { %v1380_v16 = vpop.eup %1379 }
 0x416   :  { %v1792_v18 = vmul.f32 %v615_v15, %v609_v14  ;;  %v616_v22 = vadd.f32 1.0, %v1380_v16  ;;  %v965_v14 = vld [vmem:[#allocation10 + $0x8] sm:$0xff]  ;;  %v1808_v15 = vld [vmem:[#allocation13 + $0x8] sm:$0xff] }
 0x417   :  { %1309 = vmatprep.subr.mxu0 %v965_v14  ;;  %v674_v16 = vrot.slane %v1808_v15, %v162_v30 }
 0x418   :  { %v619_v23 = vsel %vm563_vm13, %v1792_v18, 0.0  ;;  %v618_v25 = vmul.f32 %v616_v22, %v610_v20  ;;  %v627_v7 = vmul.f32 %v1792_v18, %v1792_v18  ;;  %1310 = vmatpush3.msra.mxu0 %v965_v14 }
 0x419   :  { %620 = vadd.xlane.f32.xlu0 %v619_v23 }
 0x41a   :  { %v622_v55 = vsel %vm563_vm13, %v618_v25, 0.0  ;;  %v628_v56 = vmul.f32 %v618_v25, %v618_v25  ;;  %v629_v26 = vsel %vm563_vm13, %v627_v7, 0.0 }
 0x41b   :  { %623 = vadd.xlane.f32.xlu1 %v622_v55 }
 0x41c   :  { %v632_v27 = vsel %vm563_vm13, %v628_v56, 0.0 }
 0x41d   :  { %630 = vadd.xlane.f32.xlu0 %v629_v26 }
 0x41f   :  { %633 = vadd.xlane.f32.xlu1 %v632_v27 }
 0x4a2   :  { %v621_v49 = vpop.xlane.xlu0 %620 }
 0x4a3   :  { %v625_v38 = vmul.f32 0.015625, %v621_v49 }
 0x4a4   :  { %v624_v41 = vpop.xlane.xlu1 %623 }
 0x4a5   :  { %v626_v52 = vmul.f32 0.015625, %v624_v41  ;;  %v637_v43 = vmul.f32 %v625_v38, %v625_v38  ;;  %v643_v0 = vsub.f32 %v1792_v18, %v625_v38 }
 0x4a6   :  { %v631_v42 = vpop.xlane.xlu0 %630 }
 0x4a7   :  { %v635_v44 = vmul.f32 0.015625, %v631_v42  ;;  %v638_v47 = vmul.f32 %v626_v52, %v626_v52  ;;  %v644_v2 = vsub.f32 %v618_v25, %v626_v52 }
 0x4a8   :  { %v634_v45 = vpop.xlane.xlu1 %633 }
 0x4a9   :  { %v639_v48 = vsub.f32 %v635_v44, %v637_v43  ;;  %v636_v53 = vmul.f32 0.015625, %v634_v45 }
 0x4ab   :  { %v641_v50 = vmax.f32 %v639_v48, 0.0  ;;  %v640_v40 = vsub.f32 %v636_v53, %v638_v47 }
 0x4ad   :  { %v645_v54 = vadd.f32 1e-05, %v641_v50  ;;  %v642_v58 = vmax.f32 %v640_v40, 0.0 }
 0x4af   :  { %1381 = vrsqrt.f32 %v645_v54  ;;  %v646_v60 = vadd.f32 1e-05, %v642_v58 }
 0x4b1   :  { %1383 = vrsqrt.f32 %v646_v60 }
 0x4bc   :  { %v1382_v1 = vpop.eup %1381 }
 0x4bd   :  { %v649_v5 = vmul.f32 %v1382_v1, %v643_v0 }
 0x4be   :  { %v1384_v9 = vpop.eup %1383 }
 0x4bf   :  { %v650_v61 = vmul.f32 %v1384_v9, %v644_v2  ;;  %v655_v11 = vmul.f32 %v654_v59, %v649_v5 }
 0x4c1   :  { %v656_v3 = vmul.f32 %v654_v59, %v650_v61  ;;  %v661_v4 = vadd.f32 %v660_v51, %v655_v11 }
 0x4c3   :  { %v662_v13 = vadd.f32 %v660_v51, %v656_v3  ;;  %1306 = vmatprep.mubr.msk.f32.mxu1 %vm563_vm13, %v661_v4 }
 0x4c5   :  { %1307 = vmatmul.mubr.msk.f32.vlgmr.msra.gmra.mxu1 %vm563_vm13, %v662_v13 }
 0x585   :  { %v1308_v31 = vpop.f32.mrf.mxu1 }
 0x586   :  { %v1813_v18 = vadd.f32 %v1308_v31, %v674_v16 }
 0x587   :  { %v747_v20 = vpop.f32.mrf.mxu1 }
 0x588   :  { %v863_v22 = vand.u32 2139095040, %v1813_v18  ;;  %v1816_v23 = vadd.f32 %v747_v20, %v674_v16  ;;  %v860_v25 = vand.u32 2147483647, %v1813_v18 }
 0x58a   :  { %v864_v7 = vshrl.u32 %v863_v22, 23  ;;  %v759_v55 = vand.u32 2139095040, %v1816_v23  ;;  %v867_v27 = vand.u32 8388607, %v860_v25  ;;  %v756_v30 = vand.u32 2147483647, %v1816_v23 }
 0x58c   :  { %v1234_v56 = vadd.s32 4294967169, %v864_v7  ;;  %v760_v26 = vshrl.u32 %v759_v55, 23  ;;  %v868_v35 = vor.u32 8388608, %v867_v27  ;;  %v763_v37 = vand.u32 8388607, %v756_v30 }
 0x58e   :  { %v870_v28 = vadd.s32 1, %v1234_v56  ;;  %v1230_v33 = vadd.s32 4294967169, %v760_v26  ;;  %v1825_v52 = vshll.u32 %v868_v35, 8  ;;  %v764_v45 = vor.u32 8388608, %v763_v37 }
 0x590   :  { %vm871_vm14 = vcmp.gt.s32.totalorder %v870_v28, 0  ;;  %v766_v34 = vadd.s32 1, %v1230_v33  ;;  %v804_v7 = vshll.u32 %v764_v45, 8 }
 0x591   :  { %v872_v36 = vsel %vm871_vm14, %v870_v28, 0  ;;  %vm862_vm14 = vcmp.lt.s32.totalorder %v1813_v18, 0 }
 0x592   :  { %v874_v39 = vand.u32 31, %v872_v36  ;;  %vm767_vm15 = vcmp.gt.s32.totalorder %v766_v34, 0  ;;  %v873_v49 = vshrl.u32 %v872_v36, 5 }
 0x593   :  { %v768_v21 = vsel %vm767_vm15, %v766_v34, 0  ;;  %vm861_vm15 = vcmp.le.f32.partialorder %v860_v25, 0.7853982 }
 0x594   :  { %v875_v38 = vsub.s32 32, %v874_v39  ;;  %v770_v41 = vand.u32 31, %v768_v21  ;;  %v877_v42 = vshll.u32 %v1578_v8, %v874_v39  ;;  %v880_v43 = vshll.u32 %v1579_v10, %v874_v39 }
 0x595   :  { %v883_v44 = vshll.u32 %v1580_v12, %v874_v39  ;;  %v886_v53 = vshll.u32 %v1581_v17, %v874_v39  ;;  %v889_v50 = vshll.u32 %v1582_v19, %v874_v39  ;;  %vm892_vm1 = vcmp.lt.s32.totalorder %v873_v49, 1 }
 0x596   :  { %v878_v47 = vshrl.u32 %v1579_v10, %v875_v38  ;;  %v881_v48 = vshrl.u32 %v1580_v12, %v875_v38  ;;  %v771_v40 = vsub.s32 32, %v770_v41  ;;  %v884_v54 = vshrl.u32 %v1581_v17, %v875_v38 }
 0x597   :  { %v887_v58 = vshrl.u32 %v1582_v19, %v875_v38  ;;  %v890_v60 = vshrl.u32 %v1583_v24, %v875_v38  ;;  %v876_v62 = vshrl.u32 %v1578_v8, %v875_v38  ;;  %vm893_vm2 = vcmp.lt.s32.totalorder %v873_v49, 2 }
 0x598   :  { %v879_v63 = vor.u32 %v878_v47, %v877_v42  ;;  %v882_v0 = vor.u32 %v881_v48, %v880_v43  ;;  %v885_v59 = vor.u32 %v884_v54, %v883_v44  ;;  %vm894_vm3 = vcmp.lt.s32.totalorder %v873_v49, 3 }
 0x599   :  { %v888_v1 = vor.u32 %v887_v58, %v886_v53  ;;  %v891_v2 = vor.u32 %v890_v60, %v889_v50  ;;  %vm895_vm4 = vcmp.lt.s32.totalorder %v873_v49, 4  ;;  %v774_v16 = vshrl.u32 %v1579_v10, %v771_v40 }
 0x59a   :  { %v896_v5 = vsel %vm892_vm1, %v876_v62, %v879_v63  ;;  %v900_v51 = vsel %vm892_vm1, %v879_v63, %v882_v0  ;;  %v897_v9 = vsel %vm895_vm4, %v885_v59, 2102212464  ;;  %v904_v11 = vsel %vm892_vm1, %v882_v0, %v885_v59 }
 0x59b   :  { %v901_v61 = vsel %vm895_vm4, %v888_v1, 920167782  ;;  %v905_v3 = vsel %vm895_vm4, %v891_v2, 1326507024  ;;  %v898_v4 = vsel %vm894_vm3, %v882_v0, %v897_v9  ;;  %v773_v22 = vshll.u32 %v1578_v8, %v770_v41 }
 0x59c   :  { %v902_v13 = vsel %vm894_vm3, %v885_v59, %v901_v61  ;;  %v906_v14 = vsel %vm894_vm3, %v888_v1, %v905_v3  ;;  %v769_v28 = vshrl.u32 %v768_v21, 5  ;;  %v899_v33 = vsel %vm893_vm2, %v896_v5, %v898_v4 }
 0x59d   :  { %v903_v31 = vsel %vm893_vm2, %v900_v51, %v902_v13  ;;  %v907_v20 = vsel %vm893_vm2, %v904_v11, %v906_v14  ;;  %v776_v34 = vshll.u32 %v1579_v10, %v770_v41  ;;  %v777_v35 = vshrl.u32 %v1580_v12, %v771_v40 }
 0x59e   :  { %v1843_v55 = vmul.u32.u64.low %v1825_v52, %v907_v20  ;;  %v1844_v56 = vmul.u32.u64.high %v1825_v52, %v907_v20, %v1843_v55  ;;  %v1847_v26 = vmul.u32.u64.low %v1825_v52, %v903_v31  ;;  %v1848_v27 = vmul.u32.u64.high %v1825_v52, %v903_v31, %v1847_v26 }
 0x59f   :  { %v775_v36 = vor.u32 %v774_v16, %v773_v22  ;;  %v779_v37 = vshll.u32 %v1580_v12, %v770_v41  ;;  %v780_v39 = vshrl.u32 %v1581_v17, %v771_v40  ;;  %v783_v38 = vshrl.u32 %v1582_v19, %v771_v40 }
 0x5a0   :  { %v778_v42 = vor.u32 %v777_v35, %v776_v34  ;;  %v782_v43 = vshll.u32 %v1581_v17, %v770_v41  ;;  %v785_v44 = vshll.u32 %v1582_v19, %v770_v41  ;;  %v786_v21 = vshrl.u32 %v1583_v24, %v771_v40 }
 0x5a1   :  { %v915_v49 = vmul.u32 %v1825_v52, %v899_v33  ;;  %vm917_vm5 = vc.u32 %v1844_v56, %v1847_v26  ;;  %v918_v10 = vadd.s32 1, %v1848_v27  ;;  %v781_v45 = vor.u32 %v780_v39, %v779_v37 }
 0x5a2   :  { %v784_v12 = vor.u32 %v783_v38, %v782_v43  ;;  %v787_v47 = vor.u32 %v786_v21, %v785_v44  ;;  %vm788_vm6 = vcmp.lt.s32.totalorder %v769_v28, 1  ;;  %vm791_vm7 = vcmp.lt.s32.totalorder %v769_v28, 4 }
 0x5a3   :  { %v919_v48 = vsel %vm917_vm5, %v918_v10, %v1848_v27  ;;  %v772_v17 = vshrl.u32 %v1578_v8, %v771_v40  ;;  %v793_v53 = vsel %vm791_vm7, %v781_v45, 2102212464  ;;  %v796_v19 = vsel %vm788_vm6, %v775_v36, %v778_v42 }
 0x5a4   :  { %v920_v41 = vadd.s32 %v919_v48, %v915_v49  ;;  %vm790_vm8 = vcmp.lt.s32.totalorder %v769_v28, 3  ;;  %v797_v24 = vsel %vm791_vm7, %v784_v12, 920167782  ;;  %v800_v52 = vsel %vm788_vm6, %v778_v42, %v781_v45 }
 0x5a5   :  { %vm789_vm9 = vcmp.lt.s32.totalorder %v769_v28, 2  ;;  %v792_v50 = vsel %vm788_vm6, %v772_v17, %v775_v36  ;;  %v798_v54 = vsel %vm790_vm8, %v781_v45, %v797_v24  ;;  %v801_v58 = vsel %vm791_vm7, %v787_v47, 1326507024 }
 0x5a6   :  { %v921_v60 = vadd.s32 536870912, %v920_v41  ;;  %v794_v62 = vsel %vm790_vm8, %v778_v42, %v793_v53  ;;  %v799_v63 = vsel %vm789_vm9, %v796_v19, %v798_v54  ;;  %v802_v0 = vsel %vm790_vm8, %v784_v12, %v801_v58 }
 0x5a7   :  { %v803_v59 = vsel %vm789_vm9, %v800_v52, %v802_v0  ;;  %v1866_v1 = vmul.u32.u64.low %v804_v7, %v799_v63  ;;  %v1867_v2 = vmul.u32.u64.high %v804_v7, %v799_v63, %v1866_v1  ;;  %v795_v51 = vsel %vm789_vm9, %v792_v50, %v794_v62 }
 0x5a8   :  { %v922_v5 = vshrl.u32 %v921_v60, 30  ;;  %v1869_v8 = vmul.u32.u64.low %v804_v7, %v803_v59  ;;  %v1870_v40 = vmul.u32.u64.high %v804_v7, %v803_v59, %v1869_v8  ;;  %v811_v3 = vmul.u32 %v804_v7, %v795_v51 }
 0x5a9   :  { %v814_v61 = vadd.s32 1, %v1867_v2  ;;  %v916_v34 = vadd.s32 %v1847_v26, %v1844_v56  ;;  %v964_v8 = vld [vmem:[#allocation10] sm:$0xff]  ;;  %vm758_vm1 = vcmp.lt.s32.totalorder %v1816_v23, 0  ;;  %vm1885_vm2 = vcmp.le.f32.partialorder %v756_v30, 0.7853982 }
 0x5aa   :  { %v923_v9 = vshll.u32 %v922_v5, 30  ;;  %vm813_vm10 = vc.u32 %v1870_v40, %v1866_v1  ;;  %v812_v17 = vadd.s32 %v1866_v1, %v1870_v40  ;;  %v946_v19 = vsub.s32 4, %v922_v5  ;;  %1311 = vmatprep.subr.mxu0 %v964_v8 }
 0x5ab   :  { %v815_v4 = vsel %vm813_vm10, %v814_v61, %v1867_v2  ;;  %1312 = vmatpush3.msra.mxu0 %v964_v8  ;;  %vm952_vm6 = vweird.f32 %v1813_v18  ;;  %vm848_vm10 = vweird.f32 %v1816_v23 }
 0x5ac   :  { %v924_v11 = vsub.s32 %v920_v41, %v923_v9  ;;  %v816_v14 = vadd.s32 %v815_v4, %v811_v3  ;;  %v947_v62 = vsel %vm862_vm14, %v946_v19, %v922_v5 }
 0x5ad   :  { %v949_v1 = vsel %vm861_vm15, 0, %v947_v62 }
 0x5ae   :  { %v926_v13 = vsub.s32 0, %v924_v11  ;;  %v817_v31 = vadd.s32 536870912, %v816_v14  ;;  %v953_v40 = vadd.s32 3, %v949_v1 }
 0x5b0   :  { %v1235_v16 = vmin.u32 %v926_v13, %v924_v11  ;;  %v818_v22 = vshrl.u32 %v817_v31, 30 }
 0x5b2   :  { %v928_v20 = vclz %v1235_v16  ;;  %v819_v27 = vshll.u32 %v818_v22, 30  ;;  %v842_v25 = vsub.s32 4, %v818_v22 }
 0x5b4   :  { %v1236_v55 = vadd.s32 4294967294, %v928_v20  ;;  %v820_v33 = vsub.s32 %v816_v14, %v819_v27  ;;  %v843_v3 = vsel %vm758_vm1, %v842_v25, %v818_v22 }
 0x5b5   :  { %v845_v30 = vsel %vm1885_vm2, 0, %v843_v3 }
 0x5b6   :  { %vm1237_vm11 = vcmp.lt.s32.totalorder %v1236_v55, 0  ;;  %v822_v36 = vsub.s32 0, %v820_v33  ;;  %v849_v27 = vadd.s32 3, %v845_v30  ;;  %v1100_v30 = vrot.slane %v1808_v15, %v473_v6 }
 0x5b7   :  { %v931_v28 = vsel %vm1237_vm11, 0, %v1236_v55 }
 0x5b8   :  { %v932_v35 = vsub.s32 32, %v931_v28  ;;  %v936_v7 = vsub.s32 4294967266, %v931_v28  ;;  %v933_v37 = vshll.u32 %v924_v11, %v931_v28  ;;  %v1231_v42 = vmin.u32 %v822_v36, %v820_v33 }
 0x5b9   :  { %v954_v11 = vand.u32 3, %v953_v40  ;;  %v850_v22 = vand.u32 3, %v849_v27 }
 0x5ba   :  { %v934_v39 = vshrl.u32 %v916_v34, %v932_v35  ;;  %v937_v38 = vadd.s32 127, %v936_v7  ;;  %v824_v21 = vclz %v1231_v42 }
 0x5bb   :  { %vm959_vm3 = vcmp.eq.s32.totalorder %v954_v11, 2  ;;  %vm956_vm4 = vcmp.eq.s32.totalorder %v954_v11, 0  ;;  %vm955_vm5 = vcmp.lt.s32.totalorder %v954_v11, 2  ;;  %vm855_vm7 = vcmp.eq.s32.totalorder %v850_v22, 2 }
 0x5bc   :  { %v935_v43 = vor.u32 %v934_v39, %v933_v37  ;;  %v938_v44 = vshll.u32 %v937_v38, 23  ;;  %v1232_v10 = vadd.s32 4294967294, %v824_v21  ;;  %vm852_vm8 = vcmp.eq.s32.totalorder %v850_v22, 0  ;;  %v1105_v21 = vld [vmem:[#allocation11 + $0x10] sm:$0xff] }
 0x5bd   :  { %vm851_vm9 = vcmp.lt.s32.totalorder %v850_v22, 2  ;;  %v1094_v11 = vrot.slane %v1808_v15, %v178_v46 }
 0x5be   :  { %v939_v49 = vor.u32 4788187, %v938_v44  ;;  %v942_v12 = vcvt.s32.f32 %v935_v43  ;;  %vm1233_vm13 = vcmp.lt.s32.totalorder %v1232_v10, 0 }
 0x5bf   :  { %v827_v48 = vsel %vm1233_vm13, 0, %v1232_v10  ;;  %v1397_v10 = vld [vmem:[#allocation2] sm:$0xff] }
 0x5c0   :  { %v940_v45 = vand.u32 2147483647, %v939_v49  ;;  %v828_v56 = vsub.s32 32, %v827_v48  ;;  %v832_v26 = vsub.s32 4294967266, %v827_v48  ;;  %v829_v41 = vshll.u32 %v820_v33, %v827_v48  ;;  %v1106_v33 = vld [vmem:[#allocation11 + $0x18] sm:$0xff]  ;;  %v1104_v49 = vld [vmem:[#allocation11 + $0x8] sm:$0xff] }
 0x5c1   :  { %1316 = vmatprep.subr.mxu0 %v1106_v33 }
 0x5c2   :  { %v943_v47 = vmul.f32 %v942_v12, %v940_v45  ;;  %v830_v24 = vshrl.u32 %v812_v17, %v828_v56  ;;  %v833_v52 = vadd.s32 127, %v832_v26  ;;  %v1103_v45 = vld [vmem:[#allocation11] sm:$0xff]  ;;  %v1398_v12 = vld [vmem:[#allocation2 + $0x8] sm:$0xff] }
 0x5c4   :  { %v944_v53 = vxor.u32 2147483648, %v943_v47  ;;  %v831_v58 = vor.u32 %v830_v24, %v829_v41  ;;  %v834_v60 = vshll.u32 %v833_v52, 23 }
 0x5c6   :  { %v945_v50 = vsel %vm862_vm14, %v944_v53, %v943_v47  ;;  %v835_v63 = vor.u32 4788187, %v834_v60  ;;  %v838_v59 = vcvt.s32.f32 %v831_v58  ;;  %v969_v47 = vrot.slane %v1808_v15, %v168_v32 }
 0x5c7   :  { %v948_v54 = vsel %vm861_vm15, %v1813_v18, %v945_v50 }
 0x5c8   :  { %1385 = vcosq.f32 %v948_v54  ;;  %v836_v0 = vand.u32 2147483647, %v835_v63 }
 0x5c9   :  { %1387 = vsinq.f32 %v948_v54 }
 0x5ca   :  { %v839_v2 = vmul.f32 %v838_v59, %v836_v0 }
 0x5cc   :  { %v840_v51 = vxor.u32 2147483648, %v839_v2 }
 0x5ce   :  { %v841_v5 = vsel %vm758_vm1, %v840_v51, %v839_v2 }
 0x5cf   :  { %v844_v61 = vsel %vm1885_vm2, %v1816_v23, %v841_v5 }
 0x5d0   :  { %1389 = vcosq.f32 %v844_v61 }
 0x5d1   :  { %1391 = vsinq.f32 %v844_v61 }
 0x5d5   :  { %v1386_v4 = vpop.eup %1385 }
 0x5d6   :  { %v1388_v13 = vpop.eup %1387  ;;  %v960_v14 = vxor.u32 2147483648, %v1386_v4 }
 0x5d7   :  { %v957_v16 = vxor.u32 2147483648, %v1388_v13 }
 0x5d8   :  { %v961_v31 = vsel %vm959_vm3, %v960_v14, %v1388_v13 }
 0x5d9   :  { %v958_v20 = vsel %vm956_vm4, %v1386_v4, %v957_v16  ;;  %v1110_v4 = vrot.slane %v1808_v15, %v599_v57 }
 0x5da   :  { %v962_v55 = vsel %vm955_vm5, %v958_v20, %v961_v31 }
 0x5db   :  { %v963_v28 = vsel %vm952_vm6, nan, %v962_v55 }
 0x5dc   :  { %974 = vrot.lane.b32.xlu1 %v963_v28, %s1585_s6 }
 0x5dd   :  { %v1390_v34 = vpop.eup %1389 }
 0x5de   :  { %v1392_v35 = vpop.eup %1391  ;;  %v856_v7 = vxor.u32 2147483648, %v1390_v34 }
 0x5df   :  { %v853_v36 = vxor.u32 2147483648, %v1392_v35 }
 0x5e0   :  { %v857_v37 = vsel %vm855_vm7, %v856_v7, %v1392_v35 }
 0x5e1   :  { %v854_v39 = vsel %vm852_vm8, %v1390_v34, %v853_v36 }
 0x5e2   :  { %v858_v38 = vsel %vm851_vm9, %v854_v39, %v857_v37 }
 0x5e3   :  { %v859_v42 = vsel %vm848_vm10, nan, %v858_v38 }
 0x5e4   :  { %972 = vrot.lane.b32.xlu0 %v859_v42, %s1585_s6 }
 0x64e   :  { %v975_v44 = vpop.permute.xlu1 %974 }
 0x656   :  { %v973_v43 = vpop.permute.xlu0 %972 }
 0x657   :  { %1313 = vmatprep.mubr.msk.f32.mxu0 %vm481_vm12, %v973_v43 }
 0x658   :  { %1314 = vmatmul.mubr.msk.f32.vlgmr.msra.gmra.mxu0 %vm481_vm12, %v975_v44  ;;  %vm1057_vm12 = vcmask 392192  }
 0x659   :  { %1317 = vmatpush3.msra.mxu0 %v1106_v33  ;;  %1324 = vmatprep.mubr.msk.f32.mxu0 %vm126_vm0, %v1397_v10 }
 0x65a   :  { %1318 = vmatprep.subr.mxu0 %v1105_v21 }
 0x65b   :  { %1319 = vmatpush3.msra.mxu0 %v1105_v21 }
 0x65c   :  { %1320 = vmatprep.subr.mxu0 %v1104_v49 }
 0x65d   :  { %1321 = vmatpush3.msra.mxu0 %v1104_v49 }
 0x65e   :  { %1322 = vmatprep.subr.mxu0 %v1103_v45 }
 0x65f   :  { %1323 = vmatpush3.msra.mxu0 %v1103_v45 }
 0x660   :  { %1325 = vmatmul.mubr.msk.f32.vlgmr.msra.gmra.mxu0 %vm126_vm0, %v1398_v12 }
 0x718   :  { %v1315_v48 = vpop.f32.mrf.mxu0 }
 0x719   :  { %v1052_v17 = vadd.f32 %v1315_v48, %v969_v47 }
 0x71a   :  { %v1046_v56 = vpop.f32.mrf.mxu0 }
 0x71b   :  { %v1056_v26 = vadd.f32 %v1052_v17, %v1813_v18  ;;  %v1047_v53 = vadd.f32 %v1046_v56, %v969_v47 }
 0x71d   :  { %v1055_v19 = vadd.f32 %v1047_v53, %v1816_v23  ;;  %v1061_v41 = vsel %vm1057_vm12, %v1056_v26, 0.0  ;;  %v1068_v50 = vmul.f32 %v1056_v26, %v1056_v26 }
 0x71e   :  { %1062 = vadd.xlane.f32.xlu0 %v1061_v41 }
 0x71f   :  { %v1058_v24 = vsel %vm1057_vm12, %v1055_v19, 0.0  ;;  %v1067_v52 = vmul.f32 %v1055_v19, %v1055_v19  ;;  %v1072_v32 = vsel %vm1057_vm12, %v1068_v50, 0.0 }
 0x720   :  { %1059 = vadd.xlane.f32.xlu1 %v1058_v24  ;;  %v1326_v61 = vpop.f32.mrf.mxu0 }
 0x721   :  { %v1069_v54 = vsel %vm1057_vm12, %v1067_v52, 0.0  ;;  %v1189_v34 = vadd.f32 %v1326_v61, %v1110_v4 }
 0x722   :  { %1070 = vadd.xlane.f32.xlu0 %v1069_v54  ;;  %v1183_v14 = vpop.f32.mrf.mxu0 }
 0x723   :  { %v1184_v28 = vadd.f32 %v1183_v14, %v1110_v4 }
 0x724   :  { %1073 = vadd.xlane.f32.xlu1 %v1072_v32 }
 0x7a7   :  { %v1063_v58 = vpop.xlane.xlu0 %1062 }
 0x7a8   :  { %v1066_v18 = vmul.f32 0.020833334, %v1063_v58 }
 0x7a9   :  { %v1060_v60 = vpop.xlane.xlu1 %1059 }
 0x7aa   :  { %v1065_v62 = vmul.f32 0.020833334, %v1060_v60  ;;  %v1078_v1 = vmul.f32 %v1066_v18, %v1066_v18  ;;  %v1084_v16 = vsub.f32 %v1056_v26, %v1066_v18 }
 0x7ab   :  { %v1071_v63 = vpop.xlane.xlu0 %1070 }
 0x7ac   :  { %v1077_v23 = vmul.f32 %v1065_v62, %v1065_v62  ;;  %v1075_v0 = vmul.f32 0.020833334, %v1071_v63  ;;  %v1083_v3 = vsub.f32 %v1055_v19, %v1065_v62 }
 0x7ad   :  { %v1074_v59 = vpop.xlane.xlu1 %1073 }
 0x7ae   :  { %v1079_v2 = vsub.f32 %v1075_v0, %v1077_v23  ;;  %v1076_v8 = vmul.f32 0.020833334, %v1074_v59 }
 0x7b0   :  { %v1081_v40 = vmax.f32 %v1079_v2, 0.0  ;;  %v1080_v51 = vsub.f32 %v1076_v8, %v1078_v1 }
 0x7b2   :  { %v1085_v25 = vadd.f32 1e-05, %v1081_v40  ;;  %v1082_v9 = vmax.f32 %v1080_v51, 0.0 }
 0x7b4   :  { %1393 = vrsqrt.f32 %v1085_v25  ;;  %v1086_v5 = vadd.f32 1e-05, %v1082_v9 }
 0x7b6   :  { %1395 = vrsqrt.f32 %v1086_v5 }
 0x7c1   :  { %v1394_v13 = vpop.eup %1393 }
 0x7c2   :  { %v1089_v31 = vmul.f32 %v1394_v13, %v1083_v3 }
 0x7c3   :  { %v1396_v20 = vpop.eup %1395 }
 0x7c4   :  { %v1090_v55 = vmul.f32 %v1396_v20, %v1084_v16  ;;  %v1095_v27 = vmul.f32 %v1094_v11, %v1089_v31 }
 0x7c6   :  { %v1096_v33 = vmul.f32 %v1094_v11, %v1090_v55  ;;  %v1101_v22 = vadd.f32 %v1100_v30, %v1095_v27 }
 0x7c8   :  { %v1102_v46 = vadd.f32 %v1100_v30, %v1096_v33  ;;  %v1192_v35 = vadd.f32 %v1184_v28, %v1101_v22 }
 0x7ca   :  { %v1193_v57 = vadd.f32 %v1189_v34, %v1102_v46  ;;  %1194 = vst.msk [vmem:[#allocation14] sm:$0xff] %vm1057_vm12, %v1192_v35 }
 0x7cc   :  { %1195 = vst.msk [vmem:[#allocation14 + $0x8] sm:$0xff] %vm1057_vm12, %v1193_v57 }
 0x7cd   :  { %1550 = shalt.err (!%p1547_p11)
}
 0x7ce   :  { %1207 = dma.vmem_to_hbm [thread:$0]  %s1202_s13, 256, %s1933_s7, [#allocation4], %s1571_s29, %s1571_s29, %s1572_s30  }
 0x7cf   :  { %1567 = dma.done.wait [#allocation4], 256  }
 0x7d0   :  { %1568 = vsyncadd [#allocation4], 4294967040 }
 0x7d1   :  { %1211 = vsyncpa [#allocation3], 1 }
 0x7d2   :  { %1212 = vsyncpa [#allocation6], 1 }
 0x7d3   :  { %1213 = vsyncpa [#allocation9], 1 }
 0x7d4   :  { %1214 = vsyncpa [#allocation12], 1 }
 0x7d5   :  { %1215 = vsyncpa [#allocation4], 1 }

</bundles_post_ra>
